<compile_context>
chip_gen: v7x
topology: tpu7x:2x2x1
jax: 0.10.0
libtpu: 0.0.40
codegen_flags: <defaults>
</compile_context>

<pallas_src>
import jax
import jax.numpy as jnp
import numpy as np
from jax.experimental import pallas as pl
from jax.experimental.pallas import tpu as pltpu

# ---- static model / shape constants (consistent with the module) ----
K1, C1 = 5, 16            # Conv1d(1, 16, kernel_size=5)
K2, C2 = 5, 32            # Conv1d(16, 32, kernel_size=5)
POOL = 4
L_IN = 84                 # input sequence length
L1 = L_IN - K1 + 1        # 80
L1P = (L1 - POOL) // POOL + 1    # 20
L2 = L1P - K2 + 1         # 16
L2P = (L2 - POOL) // POOL + 1    # 4
FLAT = C2 * L2P           # 128  (what LazyLinear(512) infers)
H1, H2, H3, OUT = 512, 256, 128, 10
B = 8

# Constant im2col index table (trace-time constant, not a per-call HLO).
# cols1[j*L1P*B + t1*B + b, k] = x[b, 4*t1 + j + k]
_T_IDX = (POOL * np.arange(L1P, dtype=np.int32)[None, :, None]
          + np.arange(POOL, dtype=np.int32)[:, None, None]
          + np.arange(K1, dtype=np.int32)[None, None, :])        # (POOL, L1P, K1)


def convo1d_kernel(alphas_ref,                       # SMEM (5,) scalar PReLU params
                   cols1_ref,                        # (POOL*L1P*B, K1) f32 im2col
                   w1_ref, b1_ref,                   # (K1, C1), (1, C1)      f32
                   w2_ref, b2_ref,                   # (K2, C1, C2), (1, C2)  f32
                   wf1_ref, bf1_ref,                 # (FLAT, H1) bf16, (1, H1) f32
                   wf2_ref, bf2_ref,                 # (H1, H2) bf16, (1, H2) f32
                   wf3_ref, bf3_ref,                 # (H2, H3) bf16, (1, H3) f32
                   wf4_ref, bf4_ref,                 # (H3, OUT) bf16, (1, OUT) f32
                   out_ref):                         # (B, OUT) f32
    bsz = out_ref.shape[0]
    rows_phase = L1P * bsz                           # 160 rows per pool phase

    def prelu(v, a):
        return jnp.where(v >= 0, v, a * v)

    # nn.PReLU() default is a single scalar alpha per layer (num_parameters=1).
    a0 = alphas_ref[0]
    a1 = alphas_ref[1]
    a2 = alphas_ref[2]
    a3 = alphas_ref[3]
    a4 = alphas_ref[4]

    # ---- Conv1d(1 -> 16, k=5) + PReLU: ONE fused MXU contraction ----
    # cols1[j*160 + t1*8 + b, k] = x[b, 4*t1 + j + k]
    h1 = jnp.dot(cols1_ref[...], w1_ref[...],
                 preferred_element_type=jnp.float32) + b1_ref[...]     # (640, C1)
    h1 = prelu(h1, a0)

    # ---- MaxPool1d(4,4): phase max over four aligned 160-row slabs ----
    p1 = h1[0:rows_phase, :]
    for j in range(1, POOL):
        p1 = jnp.maximum(p1, h1[j * rows_phase:(j + 1) * rows_phase, :])
    # p1[t1*B + b, c1]  -> (160, C1)

    # ---- Conv1d(16 -> 32, k=5): 5 tap matmuls on aligned row slabs ----
    acc2 = jnp.zeros((L2 * bsz, C2), jnp.float32)
    for k in range(K2):
        slab = p1[k * bsz:(k + L2) * bsz, :]          # (L2*B, C1), aligned rows
        acc2 = acc2 + jnp.dot(slab, w2_ref[k],
                              preferred_element_type=jnp.float32)
    h2 = prelu(acc2 + b2_ref[...], a1)                # (L2*B, C2) = (128, 32)

    # ---- MaxPool1d(4,4) + flatten: register blocks + lane concat (no scratch) ----
    blocks = []
    for p in range(L2P):
        m = h2[(POOL * p) * bsz:(POOL * p + 1) * bsz, :]
        for j in range(1, POOL):
            r0 = (POOL * p + j) * bsz
            m = jnp.maximum(m, h2[r0:r0 + bsz, :])    # (B, C2), aligned rows
        blocks.append(m)
    # feat[b, p*C2 + c2]  (permutation folded into the precomputed fc1 weight)
    feat = jnp.concatenate(blocks, axis=1).astype(jnp.bfloat16)        # (B, FLAT)

    # ---- batched MLP: bf16 weights / f32 accumulation on the MXU ----
    h = prelu(jnp.dot(feat, wf1_ref[...],
                      preferred_element_type=jnp.float32) + bf1_ref[...], a2)
    h = prelu(jnp.dot(h.astype(jnp.bfloat16), wf2_ref[...],
                      preferred_element_type=jnp.float32) + bf2_ref[...], a3)
    h = prelu(jnp.dot(h.astype(jnp.bfloat16), wf3_ref[...],
                      preferred_element_type=jnp.float32) + bf3_ref[...], a4)
    out_ref[...] = jnp.dot(h.astype(jnp.bfloat16), wf4_ref[...],
                           preferred_element_type=jnp.float32) + bf4_ref[...]


def prepare_params(p):
    """One-time weight layout prep.

    Called ONCE, outside the jitted inference path (review item 1): all
    transposes / reshapes / bf16 casts happen here, so the hot path carries no
    per-call weight re-shuffling HLOs.
    """
    # fc1: PyTorch flat index = c2*L2P + p2 ; kernel feat lane index = p2*C2 + c2
    wf1 = jnp.transpose(p["fc1_w"].reshape(H1, C2, L2P),
                        (2, 1, 0)).reshape(FLAT, H1)
    return {
        "alphas": p["alphas"].astype(jnp.float32),
        "w1": jnp.transpose(p["conv1_w"][:, 0, :], (1, 0)).astype(jnp.float32),
        "b1": p["conv1_b"].reshape(1, C1).astype(jnp.float32),
        "w2": jnp.transpose(p["conv2_w"], (2, 1, 0)).astype(jnp.float32),
        "b2": p["conv2_b"].reshape(1, C2).astype(jnp.float32),
        "wf1": wf1.astype(jnp.bfloat16),
        "bf1": p["fc1_b"].reshape(1, H1).astype(jnp.float32),
        "wf2": p["fc2_w"].T.astype(jnp.bfloat16),
        "bf2": p["fc2_b"].reshape(1, H2).astype(jnp.float32),
        "wf3": p["fc3_w"].T.astype(jnp.bfloat16),
        "bf3": p["fc3_b"].reshape(1, H3).astype(jnp.float32),
        "wf4": p["fc4_w"].T.astype(jnp.bfloat16),
        "bf4": p["fc4_b"].reshape(1, OUT).astype(jnp.float32),
    }


def convo1d_net2_forward(x, kp):
    """x: (B, L_IN) float32, kp: prepare_params(...) -> (B, OUT) float32."""
    bsz = x.shape[0]

    # Tiny im2col slab for conv1 (~13 KB, a single fusion); the only
    # non-Pallas work left in the hot path.  Flagged for input fusion below.
    cols1 = x.astype(jnp.float32)[:, _T_IDX]                 # (B, POOL, L1P, K1)
    cols1 = jnp.transpose(cols1, (1, 2, 0, 3)).reshape(POOL * L1P * bsz, K1)

    n_in = 14
    fuse = [False] * n_in
    fuse[1] = True   # allow XLA to fold the cols1 producer into the pallas_call

    out = pl.pallas_call(
        convo1d_kernel,
        out_shape=jax.ShapeDtypeStruct((bsz, OUT), jnp.float32),
        grid=(1,),
        in_specs=[
            pl.BlockSpec(memory_space=pltpu.MemorySpace.SMEM),            # alphas
            pl.BlockSpec((POOL * L1P * bsz, K1), lambda i: (0, 0)),       # cols1
            pl.BlockSpec((K1, C1), lambda i: (0, 0)),
            pl.BlockSpec((1, C1), lambda i: (0, 0)),
            pl.BlockSpec((K2, C1, C2), lambda i: (0, 0, 0)),
            pl.BlockSpec((1, C2), lambda i: (0, 0)),
            pl.BlockSpec((FLAT, H1), lambda i: (0, 0)),
            pl.BlockSpec((1, H1), lambda i: (0, 0)),
            pl.BlockSpec((H1, H2), lambda i: (0, 0)),
            pl.BlockSpec((1, H2), lambda i: (0, 0)),
            pl.BlockSpec((H2, H3), lambda i: (0, 0)),
            pl.BlockSpec((1, H3), lambda i: (0, 0)),
            pl.BlockSpec((H3, OUT), lambda i: (0, 0)),
            pl.BlockSpec((1, OUT), lambda i: (0, 0)),
        ],
        out_specs=pl.BlockSpec((bsz, OUT), lambda i: (0, 0)),
        compiler_params=pltpu.CompilerParams(
            dimension_semantics=("arbitrary",),
            allow_input_fusion=fuse),
    )(kp["alphas"], cols1, kp["w1"], kp["b1"], kp["w2"], kp["b2"],
      kp["wf1"], kp["bf1"], kp["wf2"], kp["bf2"],
      kp["wf3"], kp["bf3"], kp["wf4"], kp["bf4"])
    return out


def init_params(key):
    """Deterministic synthetic init with PyTorch-layout shapes."""
    ks = jax.random.split(key, 12)

    def rnd(k, shape, fan_in):
        return jax.random.normal(k, shape, jnp.float32) / np.sqrt(fan_in)

    return {
        "conv1_w": rnd(ks[0], (C1, 1, K1), K1),
        "conv1_b": rnd(ks[1], (C1,), K1),
        "conv2_w": rnd(ks[2], (C2, C1, K2), C1 * K2),
        "conv2_b": rnd(ks[3], (C2,), C1 * K2),
        "fc1_w": rnd(ks[4], (H1, FLAT), FLAT),
        "fc1_b": rnd(ks[5], (H1,), FLAT),
        "fc2_w": rnd(ks[6], (H2, H1), H1),
        "fc2_b": rnd(ks[7], (H2,), H1),
        "fc3_w": rnd(ks[8], (H3, H2), H2),
        "fc3_b": rnd(ks[9], (H3,), H2),
        "fc4_w": rnd(ks[10], (OUT, H3), H3),
        "fc4_b": rnd(ks[11], (OUT,), H3),
        "alphas": jnp.full((5,), 0.25, jnp.float32),  # nn.PReLU default init
    }


def reference_forward(x, p):
    """Pure-JAX (f32) mirror of the PyTorch forward, for a correctness check."""
    def prelu(v, a):
        return jnp.where(v >= 0, v, a * v)

    bsz = x.shape[0]
    # conv1: (B, 1, L) -> (B, 16, L1)
    cols1 = jnp.stack([x[:, k:k + L1] for k in range(K1)], axis=-1)       # (B,L1,K1)
    h = jnp.einsum("btk,ok->bot", cols1, p["conv1_w"][:, 0, :]) \
        + p["conv1_b"][None, :, None]
    h = prelu(h, p["alphas"][0])
    h = h.reshape(bsz, C1, L1P, POOL).max(axis=-1)
    # conv2: (B, 16, L1P) -> (B, 32, L2)
    cols2 = jnp.stack([h[:, :, k:k + L2] for k in range(K2)], axis=-1)    # (B,C1,L2,K2)
    h = jnp.einsum("bitk,oik->bot", cols2, p["conv2_w"]) \
        + p["conv2_b"][None, :, None]
    h = prelu(h, p["alphas"][1])
    h = h.reshape(bsz, C2, L2P, POOL).max(axis=-1)
    flat = h.reshape(bsz, -1)                                             # (B, 128)
    h = prelu(flat @ p["fc1_w"].T + p["fc1_b"], p["alphas"][2])
    h = prelu(h @ p["fc2_w"].T + p["fc2_b"], p["alphas"][3])
    h = prelu(h @ p["fc3_w"].T + p["fc3_b"], p["alphas"][4])
    return h @ p["fc4_w"].T + p["fc4_b"]


if __name__ == "__main__":
    key = jax.random.PRNGKey(0)
    kx, kp_key = jax.random.split(key)
    x = jax.random.normal(kx, (B, L_IN), jnp.float32)
    params = init_params(kp_key)

    kparams = prepare_params(params)      # one-time prep, outside the hot path
    fwd = jax.jit(convo1d_net2_forward)
    out = jax.block_until_ready(fwd(x, kparams))

    ref = jax.block_until_ready(reference_forward(x, params))
    np.testing.assert_allclose(np.asarray(out), np.asarray(ref),
                               rtol=5e-2, atol=5e-2)
    assert out.shape == (B, OUT)
    print("KERNEL_OK")
</pallas_src>

<mosaic_0001>
module attributes {stable_mosaic.version = 11 : i64} {
  func.func @convo1d_kernel(%arg0: i32, %arg1: memref<5xf32, #tpu.memory_space<smem>>, %arg2: memref<640x5xf32, #tpu.memory_space<vmem>>, %arg3: memref<5x16xf32, #tpu.memory_space<vmem>>, %arg4: memref<1x16xf32, #tpu.memory_space<vmem>>, %arg5: memref<5x16x32xf32, #tpu.memory_space<vmem>>, %arg6: memref<1x32xf32, #tpu.memory_space<vmem>>, %arg7: memref<128x512xbf16, #tpu.memory_space<vmem>>, %arg8: memref<1x512xf32, #tpu.memory_space<vmem>>, %arg9: memref<512x256xbf16, #tpu.memory_space<vmem>>, %arg10: memref<1x256xf32, #tpu.memory_space<vmem>>, %arg11: memref<256x128xbf16, #tpu.memory_space<vmem>>, %arg12: memref<1x128xf32, #tpu.memory_space<vmem>>, %arg13: memref<128x10xbf16, #tpu.memory_space<vmem>>, %arg14: memref<1x10xf32, #tpu.memory_space<vmem>>, %arg15: memref<8x10xf32, #tpu.memory_space<vmem>>) attributes {dimension_semantics = [#tpu.dimension_semantics<arbitrary>], iteration_bounds = array<i64: 1>, scalar_prefetch = 0 : i64, scratch_operands = 0 : i64, tpu.core_type = #tpu.core_type<tc>, window_params = [{transform_indices = @transform_0, window_bounds = array<i64: 5>}, {pipeline_mode = #tpu.pipeline_mode<synchronous>, transform_indices = @transform_1, window_bounds = array<i64: 640, 5>}, {pipeline_mode = #tpu.pipeline_mode<synchronous>, transform_indices = @transform_2, window_bounds = array<i64: 5, 16>}, {pipeline_mode = #tpu.pipeline_mode<synchronous>, transform_indices = @transform_3, window_bounds = array<i64: 1, 16>}, {pipeline_mode = #tpu.pipeline_mode<synchronous>, transform_indices = @transform_4, window_bounds = array<i64: 5, 16, 32>}, {pipeline_mode = #tpu.pipeline_mode<synchronous>, transform_indices = @transform_5, window_bounds = array<i64: 1, 32>}, {pipeline_mode = #tpu.pipeline_mode<synchronous>, transform_indices = @transform_6, window_bounds = array<i64: 128, 512>}, {pipeline_mode = #tpu.pipeline_mode<synchronous>, transform_indices = @transform_7, window_bounds = array<i64: 1, 512>}, {pipeline_mode = #tpu.pipeline_mode<synchronous>, transform_indices = @transform_8, window_bounds = array<i64: 512, 256>}, {pipeline_mode = #tpu.pipeline_mode<synchronous>, transform_indices = @transform_9, window_bounds = array<i64: 1, 256>}, {pipeline_mode = #tpu.pipeline_mode<synchronous>, transform_indices = @transform_10, window_bounds = array<i64: 256, 128>}, {pipeline_mode = #tpu.pipeline_mode<synchronous>, transform_indices = @transform_11, window_bounds = array<i64: 1, 128>}, {pipeline_mode = #tpu.pipeline_mode<synchronous>, transform_indices = @transform_12, window_bounds = array<i64: 128, 10>}, {pipeline_mode = #tpu.pipeline_mode<synchronous>, transform_indices = @transform_13, window_bounds = array<i64: 1, 10>}, {pipeline_mode = #tpu.pipeline_mode<synchronous>, transform_indices = @transform_14, window_bounds = array<i64: 8, 10>}]} {
    %c0 = arith.constant 0 : index
    %0 = memref.load %arg1[%c0] : memref<5xf32, #tpu.memory_space<smem>>
    %c1 = arith.constant 1 : index
    %1 = memref.load %arg1[%c1] : memref<5xf32, #tpu.memory_space<smem>>
    %c2 = arith.constant 2 : index
    %2 = memref.load %arg1[%c2] : memref<5xf32, #tpu.memory_space<smem>>
    %c3 = arith.constant 3 : index
    %3 = memref.load %arg1[%c3] : memref<5xf32, #tpu.memory_space<smem>>
    %c4 = arith.constant 4 : index
    %4 = memref.load %arg1[%c4] : memref<5xf32, #tpu.memory_space<smem>>
    %c0_0 = arith.constant 0 : index
    %c0_1 = arith.constant 0 : index
    %5 = vector.load %arg2[%c0_0, %c0_1] : memref<640x5xf32, #tpu.memory_space<vmem>>, vector<640x5xf32>
    %c0_2 = arith.constant 0 : index
    %c0_3 = arith.constant 0 : index
    %6 = vector.load %arg3[%c0_2, %c0_3] : memref<5x16xf32, #tpu.memory_space<vmem>>, vector<5x16xf32>
    %cst = arith.constant dense<0.000000e+00> : vector<640x16xf32>
    %7 = tpu.matmul %5, %6, %cst {dimension_numbers = #tpu.dot_dimension_numbers<[1], [0], [0], [1], [0, 0, 1, 1], [], []>} : vector<640x5xf32>, vector<5x16xf32>, vector<640x16xf32> -> vector<640x16xf32>
    %c0_4 = arith.constant 0 : index
    %c0_5 = arith.constant 0 : index
    %8 = vector.load %arg4[%c0_4, %c0_5] : memref<1x16xf32, #tpu.memory_space<vmem>>, vector<1x16xf32>
    %9 = vector.broadcast %8 : vector<1x16xf32> to vector<640x16xf32>
    %10 = arith.addf %7, %9 : vector<640x16xf32>
    %cst_6 = arith.constant 0.000000e+00 : f32
    %11 = vector.broadcast %cst_6 : f32 to vector<640x16xf32>
    %12 = arith.cmpf oge, %10, %11 : vector<640x16xf32>
    %13 = vector.broadcast %0 : f32 to vector<640x16xf32>
    %14 = arith.mulf %13, %10 : vector<640x16xf32>
    %15 = arith.select %12, %10, %14 : vector<640x16xi1>, vector<640x16xf32>
    %16 = vector.extract_strided_slice %15 {offsets = [0, 0], sizes = [160, 16], strides = [1, 1]} : vector<640x16xf32> to vector<160x16xf32>
    %17 = vector.extract_strided_slice %15 {offsets = [160, 0], sizes = [160, 16], strides = [1, 1]} : vector<640x16xf32> to vector<160x16xf32>
    %18 = arith.maximumf %16, %17 : vector<160x16xf32>
    %19 = vector.extract_strided_slice %15 {offsets = [320, 0], sizes = [160, 16], strides = [1, 1]} : vector<640x16xf32> to vector<160x16xf32>
    %20 = arith.maximumf %18, %19 : vector<160x16xf32>
    %21 = vector.extract_strided_slice %15 {offsets = [480, 0], sizes = [160, 16], strides = [1, 1]} : vector<640x16xf32> to vector<160x16xf32>
    %22 = arith.maximumf %20, %21 : vector<160x16xf32>
    %cst_7 = arith.constant 0.000000e+00 : f32
    %23 = vector.broadcast %cst_7 : f32 to vector<128x32xf32>
    %24 = vector.extract_strided_slice %22 {offsets = [0, 0], sizes = [128, 16], strides = [1, 1]} : vector<160x16xf32> to vector<128x16xf32>
    %c0_8 = arith.constant 0 : index
    %c0_9 = arith.constant 0 : index
    %c0_10 = arith.constant 0 : index
    %25 = vector.load %arg5[%c0_8, %c0_9, %c0_10] : memref<5x16x32xf32, #tpu.memory_space<vmem>>, vector<1x16x32xf32>
    %26 = vector.shape_cast %25 : vector<1x16x32xf32> to vector<16x32xf32>
    %cst_11 = arith.constant dense<0.000000e+00> : vector<128x32xf32>
    %27 = tpu.matmul %24, %26, %cst_11 {dimension_numbers = #tpu.dot_dimension_numbers<[1], [0], [0], [1], [0, 0, 1, 1], [], []>} : vector<128x16xf32>, vector<16x32xf32>, vector<128x32xf32> -> vector<128x32xf32>
    %28 = arith.addf %23, %27 : vector<128x32xf32>
    %29 = vector.extract_strided_slice %22 {offsets = [8, 0], sizes = [128, 16], strides = [1, 1]} : vector<160x16xf32> to vector<128x16xf32>
    %c1_12 = arith.constant 1 : index
    %c0_13 = arith.constant 0 : index
    %c0_14 = arith.constant 0 : index
    %30 = vector.load %arg5[%c1_12, %c0_13, %c0_14] : memref<5x16x32xf32, #tpu.memory_space<vmem>>, vector<1x16x32xf32>
    %31 = vector.shape_cast %30 : vector<1x16x32xf32> to vector<16x32xf32>
    %cst_15 = arith.constant dense<0.000000e+00> : vector<128x32xf32>
    %32 = tpu.matmul %29, %31, %cst_15 {dimension_numbers = #tpu.dot_dimension_numbers<[1], [0], [0], [1], [0, 0, 1, 1], [], []>} : vector<128x16xf32>, vector<16x32xf32>, vector<128x32xf32> -> vector<128x32xf32>
    %33 = arith.addf %28, %32 : vector<128x32xf32>
    %34 = vector.extract_strided_slice %22 {offsets = [16, 0], sizes = [128, 16], strides = [1, 1]} : vector<160x16xf32> to vector<128x16xf32>
    %c2_16 = arith.constant 2 : index
    %c0_17 = arith.constant 0 : index
    %c0_18 = arith.constant 0 : index
    %35 = vector.load %arg5[%c2_16, %c0_17, %c0_18] : memref<5x16x32xf32, #tpu.memory_space<vmem>>, vector<1x16x32xf32>
    %36 = vector.shape_cast %35 : vector<1x16x32xf32> to vector<16x32xf32>
    %cst_19 = arith.constant dense<0.000000e+00> : vector<128x32xf32>
    %37 = tpu.matmul %34, %36, %cst_19 {dimension_numbers = #tpu.dot_dimension_numbers<[1], [0], [0], [1], [0, 0, 1, 1], [], []>} : vector<128x16xf32>, vector<16x32xf32>, vector<128x32xf32> -> vector<128x32xf32>
    %38 = arith.addf %33, %37 : vector<128x32xf32>
    %39 = vector.extract_strided_slice %22 {offsets = [24, 0], sizes = [128, 16], strides = [1, 1]} : vector<160x16xf32> to vector<128x16xf32>
    %c3_20 = arith.constant 3 : index
    %c0_21 = arith.constant 0 : index
    %c0_22 = arith.constant 0 : index
    %40 = vector.load %arg5[%c3_20, %c0_21, %c0_22] : memref<5x16x32xf32, #tpu.memory_space<vmem>>, vector<1x16x32xf32>
    %41 = vector.shape_cast %40 : vector<1x16x32xf32> to vector<16x32xf32>
    %cst_23 = arith.constant dense<0.000000e+00> : vector<128x32xf32>
    %42 = tpu.matmul %39, %41, %cst_23 {dimension_numbers = #tpu.dot_dimension_numbers<[1], [0], [0], [1], [0, 0, 1, 1], [], []>} : vector<128x16xf32>, vector<16x32xf32>, vector<128x32xf32> -> vector<128x32xf32>
    %43 = arith.addf %38, %42 : vector<128x32xf32>
    %44 = vector.extract_strided_slice %22 {offsets = [32, 0], sizes = [128, 16], strides = [1, 1]} : vector<160x16xf32> to vector<128x16xf32>
    %c4_24 = arith.constant 4 : index
    %c0_25 = arith.constant 0 : index
    %c0_26 = arith.constant 0 : index
    %45 = vector.load %arg5[%c4_24, %c0_25, %c0_26] : memref<5x16x32xf32, #tpu.memory_space<vmem>>, vector<1x16x32xf32>
    %46 = vector.shape_cast %45 : vector<1x16x32xf32> to vector<16x32xf32>
    %cst_27 = arith.constant dense<0.000000e+00> : vector<128x32xf32>
    %47 = tpu.matmul %44, %46, %cst_27 {dimension_numbers = #tpu.dot_dimension_numbers<[1], [0], [0], [1], [0, 0, 1, 1], [], []>} : vector<128x16xf32>, vector<16x32xf32>, vector<128x32xf32> -> vector<128x32xf32>
    %48 = arith.addf %43, %47 : vector<128x32xf32>
    %c0_28 = arith.constant 0 : index
    %c0_29 = arith.constant 0 : index
    %49 = vector.load %arg6[%c0_28, %c0_29] : memref<1x32xf32, #tpu.memory_space<vmem>>, vector<1x32xf32>
    %50 = vector.broadcast %49 : vector<1x32xf32> to vector<128x32xf32>
    %51 = arith.addf %48, %50 : vector<128x32xf32>
    %cst_30 = arith.constant 0.000000e+00 : f32
    %52 = vector.broadcast %cst_30 : f32 to vector<128x32xf32>
    %53 = arith.cmpf oge, %51, %52 : vector<128x32xf32>
    %54 = vector.broadcast %1 : f32 to vector<128x32xf32>
    %55 = arith.mulf %54, %51 : vector<128x32xf32>
    %56 = arith.select %53, %51, %55 : vector<128x32xi1>, vector<128x32xf32>
    %57 = vector.extract_strided_slice %56 {offsets = [0, 0], sizes = [8, 32], strides = [1, 1]} : vector<128x32xf32> to vector<8x32xf32>
    %58 = vector.extract_strided_slice %56 {offsets = [8, 0], sizes = [8, 32], strides = [1, 1]} : vector<128x32xf32> to vector<8x32xf32>
    %59 = arith.maximumf %57, %58 : vector<8x32xf32>
    %60 = vector.extract_strided_slice %56 {offsets = [16, 0], sizes = [8, 32], strides = [1, 1]} : vector<128x32xf32> to vector<8x32xf32>
    %61 = arith.maximumf %59, %60 : vector<8x32xf32>
    %62 = vector.extract_strided_slice %56 {offsets = [24, 0], sizes = [8, 32], strides = [1, 1]} : vector<128x32xf32> to vector<8x32xf32>
    %63 = arith.maximumf %61, %62 : vector<8x32xf32>
    %64 = vector.extract_strided_slice %56 {offsets = [32, 0], sizes = [8, 32], strides = [1, 1]} : vector<128x32xf32> to vector<8x32xf32>
    %65 = vector.extract_strided_slice %56 {offsets = [40, 0], sizes = [8, 32], strides = [1, 1]} : vector<128x32xf32> to vector<8x32xf32>
    %66 = arith.maximumf %64, %65 : vector<8x32xf32>
    %67 = vector.extract_strided_slice %56 {offsets = [48, 0], sizes = [8, 32], strides = [1, 1]} : vector<128x32xf32> to vector<8x32xf32>
    %68 = arith.maximumf %66, %67 : vector<8x32xf32>
    %69 = vector.extract_strided_slice %56 {offsets = [56, 0], sizes = [8, 32], strides = [1, 1]} : vector<128x32xf32> to vector<8x32xf32>
    %70 = arith.maximumf %68, %69 : vector<8x32xf32>
    %71 = vector.extract_strided_slice %56 {offsets = [64, 0], sizes = [8, 32], strides = [1, 1]} : vector<128x32xf32> to vector<8x32xf32>
    %72 = vector.extract_strided_slice %56 {offsets = [72, 0], sizes = [8, 32], strides = [1, 1]} : vector<128x32xf32> to vector<8x32xf32>
    %73 = arith.maximumf %71, %72 : vector<8x32xf32>
    %74 = vector.extract_strided_slice %56 {offsets = [80, 0], sizes = [8, 32], strides = [1, 1]} : vector<128x32xf32> to vector<8x32xf32>
    %75 = arith.maximumf %73, %74 : vector<8x32xf32>
    %76 = vector.extract_strided_slice %56 {offsets = [88, 0], sizes = [8, 32], strides = [1, 1]} : vector<128x32xf32> to vector<8x32xf32>
    %77 = arith.maximumf %75, %76 : vector<8x32xf32>
    %78 = vector.extract_strided_slice %56 {offsets = [96, 0], sizes = [8, 32], strides = [1, 1]} : vector<128x32xf32> to vector<8x32xf32>
    %79 = vector.extract_strided_slice %56 {offsets = [104, 0], sizes = [8, 32], strides = [1, 1]} : vector<128x32xf32> to vector<8x32xf32>
    %80 = arith.maximumf %78, %79 : vector<8x32xf32>
    %81 = vector.extract_strided_slice %56 {offsets = [112, 0], sizes = [8, 32], strides = [1, 1]} : vector<128x32xf32> to vector<8x32xf32>
    %82 = arith.maximumf %80, %81 : vector<8x32xf32>
    %83 = vector.extract_strided_slice %56 {offsets = [120, 0], sizes = [8, 32], strides = [1, 1]} : vector<128x32xf32> to vector<8x32xf32>
    %84 = arith.maximumf %82, %83 : vector<8x32xf32>
    %85 = tpu.concatenate %63, %70, %77, %84 in 1 : vector<8x32xf32>, vector<8x32xf32>, vector<8x32xf32>, vector<8x32xf32> -> vector<8x128xf32>
    %86 = arith.truncf %85 : vector<8x128xf32> to vector<8x128xbf16>
    %c0_31 = arith.constant 0 : index
    %c0_32 = arith.constant 0 : index
    %87 = vector.load %arg7[%c0_31, %c0_32] : memref<128x512xbf16, #tpu.memory_space<vmem>>, vector<128x512xbf16>
    %cst_33 = arith.constant dense<0.000000e+00> : vector<8x512xf32>
    %88 = tpu.matmul %86, %87, %cst_33 {dimension_numbers = #tpu.dot_dimension_numbers<[1], [0], [0], [1], [0, 0, 1, 1], [], []>} : vector<8x128xbf16>, vector<128x512xbf16>, vector<8x512xf32> -> vector<8x512xf32>
    %c0_34 = arith.constant 0 : index
    %c0_35 = arith.constant 0 : index
    %89 = vector.load %arg8[%c0_34, %c0_35] : memref<1x512xf32, #tpu.memory_space<vmem>>, vector<1x512xf32>
    %90 = vector.broadcast %89 : vector<1x512xf32> to vector<8x512xf32>
    %91 = arith.addf %88, %90 : vector<8x512xf32>
    %cst_36 = arith.constant 0.000000e+00 : f32
    %92 = vector.broadcast %cst_36 : f32 to vector<8x512xf32>
    %93 = arith.cmpf oge, %91, %92 : vector<8x512xf32>
    %94 = vector.broadcast %2 : f32 to vector<8x512xf32>
    %95 = arith.mulf %94, %91 : vector<8x512xf32>
    %96 = arith.select %93, %91, %95 : vector<8x512xi1>, vector<8x512xf32>
    %97 = arith.truncf %96 : vector<8x512xf32> to vector<8x512xbf16>
    %c0_37 = arith.constant 0 : index
    %c0_38 = arith.constant 0 : index
    %98 = vector.load %arg9[%c0_37, %c0_38] : memref<512x256xbf16, #tpu.memory_space<vmem>>, vector<512x256xbf16>
    %cst_39 = arith.constant dense<0.000000e+00> : vector<8x256xf32>
    %99 = tpu.matmul %97, %98, %cst_39 {dimension_numbers = #tpu.dot_dimension_numbers<[1], [0], [0], [1], [0, 0, 1, 1], [], []>} : vector<8x512xbf16>, vector<512x256xbf16>, vector<8x256xf32> -> vector<8x256xf32>
    %c0_40 = arith.constant 0 : index
    %c0_41 = arith.constant 0 : index
    %100 = vector.load %arg10[%c0_40, %c0_41] : memref<1x256xf32, #tpu.memory_space<vmem>>, vector<1x256xf32>
    %101 = vector.broadcast %100 : vector<1x256xf32> to vector<8x256xf32>
    %102 = arith.addf %99, %101 : vector<8x256xf32>
    %cst_42 = arith.constant 0.000000e+00 : f32
    %103 = vector.broadcast %cst_42 : f32 to vector<8x256xf32>
    %104 = arith.cmpf oge, %102, %103 : vector<8x256xf32>
    %105 = vector.broadcast %3 : f32 to vector<8x256xf32>
    %106 = arith.mulf %105, %102 : vector<8x256xf32>
    %107 = arith.select %104, %102, %106 : vector<8x256xi1>, vector<8x256xf32>
    %108 = arith.truncf %107 : vector<8x256xf32> to vector<8x256xbf16>
    %c0_43 = arith.constant 0 : index
    %c0_44 = arith.constant 0 : index
    %109 = vector.load %arg11[%c0_43, %c0_44] : memref<256x128xbf16, #tpu.memory_space<vmem>>, vector<256x128xbf16>
    %cst_45 = arith.constant dense<0.000000e+00> : vector<8x128xf32>
    %110 = tpu.matmul %108, %109, %cst_45 {dimension_numbers = #tpu.dot_dimension_numbers<[1], [0], [0], [1], [0, 0, 1, 1], [], []>} : vector<8x256xbf16>, vector<256x128xbf16>, vector<8x128xf32> -> vector<8x128xf32>
    %c0_46 = arith.constant 0 : index
    %c0_47 = arith.constant 0 : index
    %111 = vector.load %arg12[%c0_46, %c0_47] : memref<1x128xf32, #tpu.memory_space<vmem>>, vector<1x128xf32>
    %112 = vector.broadcast %111 : vector<1x128xf32> to vector<8x128xf32>
    %113 = arith.addf %110, %112 : vector<8x128xf32>
    %cst_48 = arith.constant 0.000000e+00 : f32
    %114 = vector.broadcast %cst_48 : f32 to vector<8x128xf32>
    %115 = arith.cmpf oge, %113, %114 : vector<8x128xf32>
    %116 = vector.broadcast %4 : f32 to vector<8x128xf32>
    %117 = arith.mulf %116, %113 : vector<8x128xf32>
    %118 = arith.select %115, %113, %117 : vector<8x128xi1>, vector<8x128xf32>
    %119 = arith.truncf %118 : vector<8x128xf32> to vector<8x128xbf16>
    %c0_49 = arith.constant 0 : index
    %c0_50 = arith.constant 0 : index
    %120 = vector.load %arg13[%c0_49, %c0_50] : memref<128x10xbf16, #tpu.memory_space<vmem>>, vector<128x10xbf16>
    %cst_51 = arith.constant dense<0.000000e+00> : vector<8x10xf32>
    %121 = tpu.matmul %119, %120, %cst_51 {dimension_numbers = #tpu.dot_dimension_numbers<[1], [0], [0], [1], [0, 0, 1, 1], [], []>} : vector<8x128xbf16>, vector<128x10xbf16>, vector<8x10xf32> -> vector<8x10xf32>
    %c0_52 = arith.constant 0 : index
    %c0_53 = arith.constant 0 : index
    %122 = vector.load %arg14[%c0_52, %c0_53] : memref<1x10xf32, #tpu.memory_space<vmem>>, vector<1x10xf32>
    %123 = vector.broadcast %122 : vector<1x10xf32> to vector<8x10xf32>
    %124 = arith.addf %121, %123 : vector<8x10xf32>
    %c0_54 = arith.constant 0 : index
    %c0_55 = arith.constant 0 : index
    %125 = vector.load %arg15[%c0_54, %c0_55] : memref<8x10xf32, #tpu.memory_space<vmem>>, vector<8x10xf32>
    tpu.vector_store %arg15[%c0_54, %c0_55], %124 {strides = array<i32>} : memref<8x10xf32, #tpu.memory_space<vmem>>, vector<8x10xf32>,
    return
  }
  func.func @transform_0(%arg0: i32) -> i32 {
    %c0_i32 = arith.constant 0 : i32
    %c0_i32_0 = arith.constant 0 : i32
    return %c0_i32 : i32
  }
  func.func @transform_1(%arg0: i32) -> (i32, i32) {
    %c0_i32 = arith.constant 0 : i32
    %c0_i32_0 = arith.constant 0 : i32
    %c0_i32_1 = arith.constant 0 : i32
    return %c0_i32, %c0_i32_0 : i32, i32
  }
  func.func @transform_2(%arg0: i32) -> (i32, i32) {
    %c0_i32 = arith.constant 0 : i32
    %c0_i32_0 = arith.constant 0 : i32
    %c0_i32_1 = arith.constant 0 : i32
    return %c0_i32, %c0_i32_0 : i32, i32
  }
  func.func @transform_3(%arg0: i32) -> (i32, i32) {
    %c0_i32 = arith.constant 0 : i32
    %c0_i32_0 = arith.constant 0 : i32
    %c0_i32_1 = arith.constant 0 : i32
    return %c0_i32, %c0_i32_0 : i32, i32
  }
  func.func @transform_4(%arg0: i32) -> (i32, i32, i32) {
    %c0_i32 = arith.constant 0 : i32
    %c0_i32_0 = arith.constant 0 : i32
    %c0_i32_1 = arith.constant 0 : i32
    %c0_i32_2 = arith.constant 0 : i32
    return %c0_i32, %c0_i32_0, %c0_i32_1 : i32, i32, i32
  }
  func.func @transform_5(%arg0: i32) -> (i32, i32) {
    %c0_i32 = arith.constant 0 : i32
    %c0_i32_0 = arith.constant 0 : i32
    %c0_i32_1 = arith.constant 0 : i32
    return %c0_i32, %c0_i32_0 : i32, i32
  }
  func.func @transform_6(%arg0: i32) -> (i32, i32) {
    %c0_i32 = arith.constant 0 : i32
    %c0_i32_0 = arith.constant 0 : i32
    %c0_i32_1 = arith.constant 0 : i32
    return %c0_i32, %c0_i32_0 : i32, i32
  }
  func.func @transform_7(%arg0: i32) -> (i32, i32) {
    %c0_i32 = arith.constant 0 : i32
    %c0_i32_0 = arith.constant 0 : i32
    %c0_i32_1 = arith.constant 0 : i32
    return %c0_i32, %c0_i32_0 : i32, i32
  }
  func.func @transform_8(%arg0: i32) -> (i32, i32) {
    %c0_i32 = arith.constant 0 : i32
    %c0_i32_0 = arith.constant 0 : i32
    %c0_i32_1 = arith.constant 0 : i32
    return %c0_i32, %c0_i32_0 : i32, i32
  }
  func.func @transform_9(%arg0: i32) -> (i32, i32) {
    %c0_i32 = arith.constant 0 : i32
    %c0_i32_0 = arith.constant 0 : i32
    %c0_i32_1 = arith.constant 0 : i32
    return %c0_i32, %c0_i32_0 : i32, i32
  }
  func.func @transform_10(%arg0: i32) -> (i32, i32) {
    %c0_i32 = arith.constant 0 : i32
    %c0_i32_0 = arith.constant 0 : i32
    %c0_i32_1 = arith.constant 0 : i32
    return %c0_i32, %c0_i32_0 : i32, i32
  }
  func.func @transform_11(%arg0: i32) -> (i32, i32) {
    %c0_i32 = arith.constant 0 : i32
    %c0_i32_0 = arith.constant 0 : i32
    %c0_i32_1 = arith.constant 0 : i32
    return %c0_i32, %c0_i32_0 : i32, i32
  }
  func.func @transform_12(%arg0: i32) -> (i32, i32) {
    %c0_i32 = arith.constant 0 : i32
    %c0_i32_0 = arith.constant 0 : i32
    %c0_i32_1 = arith.constant 0 : i32
    return %c0_i32, %c0_i32_0 : i32, i32
  }
  func.func @transform_13(%arg0: i32) -> (i32, i32) {
    %c0_i32 = arith.constant 0 : i32
    %c0_i32_0 = arith.constant 0 : i32
    %c0_i32_1 = arith.constant 0 : i32
    return %c0_i32, %c0_i32_0 : i32, i32
  }
  func.func @transform_14(%arg0: i32) -> (i32, i32) {
    %c0_i32 = arith.constant 0 : i32
    %c0_i32_0 = arith.constant 0 : i32
    %c0_i32_1 = arith.constant 0 : i32
    return %c0_i32, %c0_i32_0 : i32, i32
  }
}

</mosaic_0001>

<bundles_post_ra>
// kernel: convo1d_net2_forward.1
= control target key start
LH: loop header
LB: loop body
LE: loop exit
PB: predicated region body
PF: predicated region fallthrough
CT: control target
= control target key end

     0   :  { %19 = vsyncpa [#allocation4], 0  ;;  %s5892_s0 = inlined_call_operand.vmem [shape: f32[5], index: 0, kind: input, shape index: {}]   ;;  %s5893_s1 = inlined_call_operand.vmem [shape: f32[640,5], index: 1, kind: input, shape index: {}]   ;;  %s5894_s2 = inlined_call_operand.vmem [shape: f32[5,16], index: 2, kind: input, shape index: {}]   ;;  %s5895_s3 = inlined_call_operand.vmem [shape: f32[1,16], index: 3, kind: input, shape index: {}]   ;;  %s5896_s4 = inlined_call_operand.vmem [shape: f32[5,16,32], index: 4, kind: input, shape index: {}]   ;;  %s5897_s5 = inlined_call_operand.vmem [shape: f32[1,32], index: 5, kind: input, shape index: {}]   ;;  %s5898_s6 = inlined_call_operand.vmem [shape: bf16[128,512], index: 6, kind: input, shape index: {}]   ;;  %s5899_s7 = inlined_call_operand.vmem [shape: f32[1,512], index: 7, kind: input, shape index: {}]   ;;  %s5900_s8 = inlined_call_operand.vmem [shape: bf16[512,256], index: 8, kind: input, shape index: {}]   ;;  %s5901_s9 = inlined_call_operand.vmem [shape: f32[1,256], index: 9, kind: input, shape index: {}]   ;;  %s5902_s10 = inlined_call_operand.vmem [shape: bf16[256,128], index: 10, kind: input, shape index: {}]   ;;  %s5903_s11 = inlined_call_operand.vmem [shape: f32[1,128], index: 11, kind: input, shape index: {}]   ;;  %s5904_s12 = inlined_call_operand.vmem [shape: bf16[128,10], index: 12, kind: input, shape index: {}]   ;;  %s5905_s13 = inlined_call_operand.vmem [shape: f32[1,10], index: 13, kind: input, shape index: {}]   ;;  %s5906_s14 = inlined_call_operand.hbm [shape: f32[8,10], index: 14, kind: output, shape index: {}]  }
   0x1   :  { %20 = vsyncpa [#allocation3], 0  ;;  %s27_s15 = sshll.u32 %s5892_s0, 4  ;;  %s28_s15 = int_to_ptr.vmem [resolvable:$true] %s27_s15 }
   0x2   :  { %s4274_s16 = scalar_lea.vmem %s28_s15, 16  ;;  %p4279_p1 = scmp.lt.s32.totalorder %s28_s15, %s28_s15 }
   0x3   :  { %p4275_p0 = scmp.ne.s32.totalorder %s28_s15, %s4274_s16  ;;  %p4280_p2 = scmp.lt.s32.totalorder %s4274_s16, %s4274_s16 }
   0x5   :  { %p4281_p3 = por %p4280_p2, %p4279_p1 }
   0x7   :  { %p4282_p4 = pnand %p4281_p3, %p4275_p0 }
   0x9   :  { %4285 = shalt.err (!%p4282_p4)
}
   0xa   :  { %s4312_s17 = smov [#allocation2]  }
   0xb   :  { %30 = dma.vmem_to_smem %s28_s15, 16, %s4312_s17, [#allocation4]  }
   0xc   :  { %4308 = dma.done.wait [#allocation4], 16  }
   0xd   :  { %4309 = vsyncadd [#allocation4], 4294967280 }
   0xe   :  { %60 = sfence }
   0xf   :  { %v147_v0 = vld [vmem:[%s5894_s2] sm:$0x1f]  ;;  %vm396_vm0 = vcmask 1044480   ;;  %vm155_vm1 = vcmask 39936   ;;  %v68_v2 = vld [vmem:[%s5893_s1 + $0x8] sm:$0xff]  ;;  %v69_v3 = vld [vmem:[%s5893_s1 + $0x10] sm:$0xff] }
  0x10   :  { %v67_v1 = vld [vmem:[%s5893_s1] sm:$0xff]  ;;  %3724 = vmatprep.subr.msk.mxu0 %vm396_vm0, %v147_v0  ;;  %4026 = vmatprep.subr.msk.mxu1 %vm396_vm0, %v147_v0  ;;  %v70_v4 = vld [vmem:[%s5893_s1 + $0x18] sm:$0xff]  ;;  %v72_v6 = vld [vmem:[%s5893_s1 + $0x28] sm:$0xff]  ;;  %s62_s24 = sld [smem:[#allocation2]]  ;;  %s3225_s21 = sld [smem:[#allocation2 + $0x1]] }
  0x11   :  { %3726 = vmatprep.mubr.msk.f32.mxu0 %vm155_vm1, %v67_v1  ;;  %3725 = vmatpush3.msk.msra.mxu0 %vm396_vm0, %v147_v0  ;;  %v71_v5 = vld [vmem:[%s5893_s1 + $0x20] sm:$0xff]  ;;  %v73_v7 = vld [vmem:[%s5893_s1 + $0x30] sm:$0xff]  ;;  %v74_v8 = vld [vmem:[%s5893_s1 + $0x38] sm:$0xff]  ;;  %s4313_s22 = smov 32   ;;  %s4316_s23 = smov 96  }
  0x12   :  { %3727 = vmatmul.mubr.msk.f32.vlgmr.msra.gmra.mrb[0].mxu0 %vm155_vm1, %v68_v2  ;;  %4027 = vmatpush3.msk.msra.mxu1 %vm396_vm0, %v147_v0  ;;  %v75_v9 = vld [vmem:[%s5893_s1 + $0x40] sm:$0xff]  ;;  %v76_v11 = vld [vmem:[%s5893_s1 + $0x48] sm:$0xff]  ;;  %v77_v13 = vld [vmem:[%s5893_s1 + $0x50] sm:$0xff]  ;;  %s3228_s18 = sld [smem:[#allocation2 + $0x4]]  ;;  %s4319_s0 = smov [#allocation5]  }
  0x13   :  { %3729 = vmatprep.mubr.msk.f32.mxu0 %vm155_vm1, %v69_v3  ;;  %v131_v10 = vld [vmem:[%s5893_s1 + $0x200] sm:$0xff]  ;;  %v132_v12 = vld [vmem:[%s5893_s1 + $0x208] sm:$0xff]  ;;  %v133_v14 = vld [vmem:[%s5893_s1 + $0x210] sm:$0xff] }
  0x14   :  { %3822 = vmatprep.mubr.msk.f32.mxu1 %vm155_vm1, %v131_v10  ;;  %v134_v15 = vld [vmem:[%s5893_s1 + $0x218] sm:$0xff]  ;;  %v135_v16 = vld [vmem:[%s5893_s1 + $0x220] sm:$0xff]  ;;  %v136_v19 = vld [vmem:[%s5893_s1 + $0x228] sm:$0xff] }
  0x15   :  { %3823 = vmatmul.mubr.msk.f32.vlgmr.msra.gmra.mrb[0].mxu1 %vm155_vm1, %v132_v12  ;;  %v78_v17 = vld [vmem:[%s5893_s1 + $0x58] sm:$0xff]  ;;  %v79_v18 = vld [vmem:[%s5893_s1 + $0x60] sm:$0xff]  ;;  %v137_v20 = vld [vmem:[%s5893_s1 + $0x230] sm:$0xff] }
  0x16   :  { %3730 = vmatmul.mubr.msk.f32.gmra.mrb[2].mxu0 %vm155_vm1, %v70_v4  ;;  %3825 = vmatprep.mubr.msk.f32.mxu1 %vm155_vm1, %v133_v14  ;;  %v80_v21 = vld [vmem:[%s5893_s1 + $0x68] sm:$0xff]  ;;  %v81_v22 = vld [vmem:[%s5893_s1 + $0x70] sm:$0xff]  ;;  %v82_v23 = vld [vmem:[%s5893_s1 + $0x78] sm:$0xff] }
  0x17   :  { %3732 = vmatprep.mubr.msk.f32.mxu0 %vm155_vm1, %v71_v5  ;;  %v138_v24 = vld [vmem:[%s5893_s1 + $0x238] sm:$0xff]  ;;  %v139_v25 = vld [vmem:[%s5893_s1 + $0x240] sm:$0xff]  ;;  %v140_v27 = vld [vmem:[%s5893_s1 + $0x248] sm:$0xff] }
  0x18   :  { %v83_v26 = vld [vmem:[%s5893_s1 + $0x80] sm:$0xff]  ;;  %v141_v28 = vld [vmem:[%s5893_s1 + $0x250] sm:$0xff]  ;;  %v84_v29 = vld [vmem:[%s5893_s1 + $0x88] sm:$0xff] }
  0x19   :  { %3826 = vmatmul.mubr.msk.f32.gmra.mrb[2].mxu1 %vm155_vm1, %v134_v15  ;;  %v85_v30 = vld [vmem:[%s5893_s1 + $0x90] sm:$0xff]  ;;  %v142_v31 = vld [vmem:[%s5893_s1 + $0x258] sm:$0xff]  ;;  %v143_v32 = vld [vmem:[%s5893_s1 + $0x260] sm:$0xff] }
  0x1a   :  { %3733 = vmatmul.mubr.msk.f32.gmra.mrb[4].mxu0 %vm155_vm1, %v72_v6  ;;  %3828 = vmatprep.mubr.msk.f32.mxu1 %vm155_vm1, %v135_v16  ;;  %v86_v33 = vld [vmem:[%s5893_s1 + $0x98] sm:$0xff]  ;;  %v87_v34 = vld [vmem:[%s5893_s1 + $0xa0] sm:$0xff]  ;;  %v144_v35 = vld [vmem:[%s5893_s1 + $0x268] sm:$0xff] }
  0x1b   :  { %3735 = vmatprep.mubr.msk.f32.mxu0 %vm155_vm1, %v73_v7  ;;  %v145_v36 = vld [vmem:[%s5893_s1 + $0x270] sm:$0xff]  ;;  %v88_v37 = vld [vmem:[%s5893_s1 + $0xa8] sm:$0xff]  ;;  %v146_v39 = vld [vmem:[%s5893_s1 + $0x278] sm:$0xff] }
  0x1c   :  { %v89_v38 = vld [vmem:[%s5893_s1 + $0xb0] sm:$0xff]  ;;  %v90_v40 = vld [vmem:[%s5893_s1 + $0xb8] sm:$0xff]  ;;  %v91_v41 = vld [vmem:[%s5893_s1 + $0xc0] sm:$0xff] }
  0x1d   :  { %3829 = vmatmul.mubr.msk.f32.gmra.mrb[4].mxu1 %vm155_vm1, %v136_v19  ;;  %v92_v42 = vld [vmem:[%s5893_s1 + $0xc8] sm:$0xff]  ;;  %v93_v43 = vld [vmem:[%s5893_s1 + $0xd0] sm:$0xff]  ;;  %v94_v44 = vld [vmem:[%s5893_s1 + $0xd8] sm:$0xff] }
  0x1e   :  { %3736 = vmatmul.mubr.msk.f32.gmra.mrb[6].mxu0 %vm155_vm1, %v74_v8  ;;  %3831 = vmatprep.mubr.msk.f32.mxu1 %vm155_vm1, %v137_v20  ;;  %v95_v45 = vld [vmem:[%s5893_s1 + $0xe0] sm:$0xff]  ;;  %v96_v46 = vld [vmem:[%s5893_s1 + $0xe8] sm:$0xff]  ;;  %v97_v47 = vld [vmem:[%s5893_s1 + $0xf0] sm:$0xff] }
  0x1f   :  { %3738 = vmatprep.mubr.msk.f32.mxu0 %vm155_vm1, %v75_v9  ;;  %v98_v48 = vld [vmem:[%s5893_s1 + $0xf8] sm:$0xff]  ;;  %v99_v49 = vld [vmem:[%s5893_s1 + $0x100] sm:$0xff]  ;;  %v100_v50 = vld [vmem:[%s5893_s1 + $0x108] sm:$0xff] }
  0x20   :  { %v101_v51 = vld [vmem:[%s5893_s1 + $0x110] sm:$0xff]  ;;  %v102_v52 = vld [vmem:[%s5893_s1 + $0x118] sm:$0xff]  ;;  %v103_v53 = vld [vmem:[%s5893_s1 + $0x120] sm:$0xff] }
  0x21   :  { %3832 = vmatmul.mubr.msk.f32.gmra.mrb[6].mxu1 %vm155_vm1, %v138_v24  ;;  %v104_v54 = vld [vmem:[%s5893_s1 + $0x128] sm:$0xff]  ;;  %v105_v55 = vld [vmem:[%s5893_s1 + $0x130] sm:$0xff]  ;;  %v106_v56 = vld [vmem:[%s5893_s1 + $0x138] sm:$0xff] }
  0x22   :  { %3739 = vmatmul.mubr.msk.f32.gmra.mrb[8].mxu0 %vm155_vm1, %v76_v11  ;;  %3834 = vmatprep.mubr.msk.f32.mxu1 %vm155_vm1, %v139_v25  ;;  %v107_v57 = vld [vmem:[%s5893_s1 + $0x140] sm:$0xff]  ;;  %v108_v58 = vld [vmem:[%s5893_s1 + $0x148] sm:$0xff]  ;;  %v109_v59 = vld [vmem:[%s5893_s1 + $0x150] sm:$0xff] }
  0x23   :  { %3741 = vmatprep.mubr.msk.f32.mxu0 %vm155_vm1, %v77_v13  ;;  %v110_v60 = vld [vmem:[%s5893_s1 + $0x158] sm:$0xff]  ;;  %v111_v61 = vld [vmem:[%s5893_s1 + $0x160] sm:$0xff]  ;;  %v112_v62 = vld [vmem:[%s5893_s1 + $0x168] sm:$0xff] }
  0x24   :  { %v113_v63 = vld [vmem:[%s5893_s1 + $0x170] sm:$0xff]  ;;  %v114_v0 = vld [vmem:[%s5893_s1 + $0x178] sm:$0xff]  ;;  %v115_v1 = vld [vmem:[%s5893_s1 + $0x180] sm:$0xff] }
  0x25   :  { %3835 = vmatmul.mubr.msk.f32.gmra.mrb[8].mxu1 %vm155_vm1, %v140_v27  ;;  %v116_v2 = vld [vmem:[%s5893_s1 + $0x188] sm:$0xff]  ;;  %v117_v3 = vld [vmem:[%s5893_s1 + $0x190] sm:$0xff]  ;;  %v118_v4 = vld [vmem:[%s5893_s1 + $0x198] sm:$0xff] }
  0x26   :  { %3742 = vmatmul.mubr.msk.f32.gmra.mrb[10].mxu0 %vm155_vm1, %v78_v17  ;;  %3837 = vmatprep.mubr.msk.f32.mxu1 %vm155_vm1, %v141_v28  ;;  %v119_v5 = vld [vmem:[%s5893_s1 + $0x1a0] sm:$0xff]  ;;  %v120_v6 = vld [vmem:[%s5893_s1 + $0x1a8] sm:$0xff]  ;;  %v121_v7 = vld [vmem:[%s5893_s1 + $0x1b0] sm:$0xff] }
  0x27   :  { %3744 = vmatprep.mubr.msk.f32.mxu0 %vm155_vm1, %v79_v18  ;;  %v122_v8 = vld [vmem:[%s5893_s1 + $0x1b8] sm:$0xff]  ;;  %v123_v9 = vld [vmem:[%s5893_s1 + $0x1c0] sm:$0xff]  ;;  %v124_v10 = vld [vmem:[%s5893_s1 + $0x1c8] sm:$0xff] }
  0x28   :  { %v125_v11 = vld [vmem:[%s5893_s1 + $0x1d0] sm:$0xff]  ;;  %v126_v12 = vld [vmem:[%s5893_s1 + $0x1d8] sm:$0xff]  ;;  %v127_v13 = vld [vmem:[%s5893_s1 + $0x1e0] sm:$0xff] }
  0x29   :  { %3838 = vmatmul.mubr.msk.f32.gmra.mrb[10].mxu1 %vm155_vm1, %v142_v31  ;;  %v128_v14 = vld [vmem:[%s5893_s1 + $0x1e8] sm:$0xff]  ;;  %v129_v15 = vld [vmem:[%s5893_s1 + $0x1f0] sm:$0xff]  ;;  %v130_v16 = vld [vmem:[%s5893_s1 + $0x1f8] sm:$0xff] }
  0x2a   :  { %3745 = vmatmul.mubr.msk.f32.gmra.mrb[12].mxu0 %vm155_vm1, %v80_v21  ;;  %3840 = vmatprep.mubr.msk.f32.mxu1 %vm155_vm1, %v143_v32  ;;  %v3311_v17 = vld [vmem:[%s5896_s4 + $0x10] sm:$0xff]  ;;  %v3312_v18 = vld [vmem:[%s5896_s4 + $0x18] sm:$0xff] }
  0x2b   :  { %3747 = vmatprep.mubr.msk.f32.mxu0 %vm155_vm1, %v81_v22  ;;  %v4006_v19 = vpack.c.bf16 %v3312_v18, %v3311_v17  ;;  %v1166_v22 = vld [vmem:[%s5896_s4] sm:$0xff] }
  0x2d   :  { %3841 = vmatmul.mubr.msk.f32.gmra.mrb[12].mxu1 %vm155_vm1, %v144_v35  ;;  %4007 = vmatprep.subr.bf16.mxu1 %v4006_v19 }
  0x2e   :  { %3748 = vmatmul.mubr.msk.f32.gmra.mrb[14].mxu0 %vm155_vm1, %v82_v23  ;;  %3843 = vmatprep.mubr.msk.f32.mxu1 %vm155_vm1, %v145_v36  ;;  %v1167_v23 = vld [vmem:[%s5896_s4 + $0x8] sm:$0xff] }
  0x2f   :  { %3750 = vmatprep.mubr.msk.f32.mxu0 %vm155_vm1, %v83_v26  ;;  %4009 = vmatpush3.bf16.msra.mxu1 %v4006_v19  ;;  %v4733_v25 = vpack.c.bf16 %v1167_v23, %v1166_v22 }
  0x31   :  { %3844 = vmatmul.mubr.msk.f32.gmra.mrb[14].mxu1 %vm155_vm1, %v146_v39  ;;  %5917 = vst [vmem:[#allocation8_spill] sm:$0xff] %v4733_v25  ;;  %4011 = vmatprep.subr.bf16.mxu1 %v4733_v25 }
  0x32   :  { %3751 = vmatmul.mubr.msk.f32.gmra.mrb[16].mxu0 %vm155_vm1, %v84_v29 }
  0x33   :  { %3753 = vmatprep.mubr.msk.f32.mxu0 %vm155_vm1, %v85_v30 }
  0x36   :  { %3754 = vmatmul.mubr.msk.f32.gmra.mrb[18].mxu0 %vm155_vm1, %v86_v33 }
  0x37   :  { %3756 = vmatprep.mubr.msk.f32.mxu0 %vm155_vm1, %v87_v34 }
  0x3a   :  { %3757 = vmatmul.mubr.msk.f32.gmra.mrb[20].mxu0 %vm155_vm1, %v88_v37 }
  0x3b   :  { %3759 = vmatprep.mubr.msk.f32.mxu0 %vm155_vm1, %v89_v38 }
  0x3e   :  { %3760 = vmatmul.mubr.msk.f32.gmra.mrb[22].mxu0 %vm155_vm1, %v90_v40 }
  0x3f   :  { %3762 = vmatprep.mubr.msk.f32.mxu0 %vm155_vm1, %v91_v41 }
  0x42   :  { %3763 = vmatmul.mubr.msk.f32.gmra.mrb[24].mxu0 %vm155_vm1, %v92_v42 }
  0x43   :  { %3765 = vmatprep.mubr.msk.f32.mxu0 %vm155_vm1, %v93_v43 }
  0x46   :  { %3766 = vmatmul.mubr.msk.f32.gmra.mrb[26].mxu0 %vm155_vm1, %v94_v44 }
  0x47   :  { %3768 = vmatprep.mubr.msk.f32.mxu0 %vm155_vm1, %v95_v45  ;;  %v4761_v45 = vld [vmem:[%s5895_s3] ss:$0 sm:$0xff] }
  0x4a   :  { %3769 = vmatmul.mubr.msk.f32.gmra.mrb[28].mxu0 %vm155_vm1, %v96_v46 }
  0x4b   :  { %3771 = vmatprep.mubr.msk.f32.mxu0 %vm155_vm1, %v97_v47 }
  0x4e   :  { %3772 = vmatmul.mubr.msk.f32.gmra.mrb[30].mxu0 %vm155_vm1, %v98_v48 }
  0x4f   :  { %3774 = vmatprep.mubr.msk.f32.mxu0 %vm155_vm1, %v99_v49 }
  0x52   :  { %3775 = vmatmul.mubr.msk.f32.gmra.mrb[32].mxu0 %vm155_vm1, %v100_v50 }
  0x53   :  { %3777 = vmatprep.mubr.msk.f32.mxu0 %vm155_vm1, %v101_v51 }
  0x56   :  { %3778 = vmatmul.mubr.msk.f32.gmra.mrb[34].mxu0 %vm155_vm1, %v102_v52  ;;  %v4773_v52 = vstv %s62_s24 }
  0x57   :  { %3780 = vmatprep.mubr.msk.f32.mxu0 %vm155_vm1, %v103_v53 }
  0x5a   :  { %3781 = vmatmul.mubr.msk.f32.gmra.mrb[36].mxu0 %vm155_vm1, %v104_v54 }
  0x5b   :  { %3783 = vmatprep.mubr.msk.f32.mxu0 %vm155_vm1, %v105_v55 }
  0x5e   :  { %3784 = vmatmul.mubr.msk.f32.gmra.mrb[38].mxu0 %vm155_vm1, %v106_v56 }
  0x5f   :  { %3786 = vmatprep.mubr.msk.f32.mxu0 %vm155_vm1, %v107_v57 }
  0x62   :  { %3787 = vmatmul.mubr.msk.f32.gmra.mrb[40].mxu0 %vm155_vm1, %v108_v58 }
  0x63   :  { %3789 = vmatprep.mubr.msk.f32.mxu0 %vm155_vm1, %v109_v59 }
  0x66   :  { %3790 = vmatmul.mubr.msk.f32.gmra.mrb[42].mxu0 %vm155_vm1, %v110_v60 }
  0x67   :  { %3792 = vmatprep.mubr.msk.f32.mxu0 %vm155_vm1, %v111_v61 }
  0x6a   :  { %3793 = vmatmul.mubr.msk.f32.gmra.mrb[44].mxu0 %vm155_vm1, %v112_v62 }
  0x6b   :  { %3795 = vmatprep.mubr.msk.f32.mxu0 %vm155_vm1, %v113_v63 }
  0x6e   :  { %3796 = vmatmul.mubr.msk.f32.gmra.mrb[46].mxu0 %vm155_vm1, %v114_v0 }
  0x6f   :  { %3798 = vmatprep.mubr.msk.f32.mxu0 %vm155_vm1, %v115_v1 }
  0x72   :  { %3799 = vmatmul.mubr.msk.f32.gmra.mrb[48].mxu0 %vm155_vm1, %v116_v2 }
  0x73   :  { %3801 = vmatprep.mubr.msk.f32.mxu0 %vm155_vm1, %v117_v3 }
  0x76   :  { %3802 = vmatmul.mubr.msk.f32.gmra.mrb[50].mxu0 %vm155_vm1, %v118_v4 }
  0x77   :  { %3804 = vmatprep.mubr.msk.f32.mxu0 %vm155_vm1, %v119_v5 }
  0x7a   :  { %3805 = vmatmul.mubr.msk.f32.gmra.mrb[52].mxu0 %vm155_vm1, %v120_v6 }
  0x7b   :  { %3807 = vmatprep.mubr.msk.f32.mxu0 %vm155_vm1, %v121_v7 }
  0x7e   :  { %3808 = vmatmul.mubr.msk.f32.gmra.mrb[54].mxu0 %vm155_vm1, %v122_v8 }
  0x7f   :  { %3810 = vmatprep.mubr.msk.f32.mxu0 %vm155_vm1, %v123_v9 }
  0x82   :  { %3811 = vmatmul.mubr.msk.f32.gmra.mrb[56].mxu0 %vm155_vm1, %v124_v10 }
  0x83   :  { %3813 = vmatprep.mubr.msk.f32.mxu0 %vm155_vm1, %v125_v11 }
  0x86   :  { %3814 = vmatmul.mubr.msk.f32.gmra.mrb[58].mxu0 %vm155_vm1, %v126_v12 }
  0x87   :  { %3816 = vmatprep.mubr.msk.f32.mxu0 %vm155_vm1, %v127_v13 }
  0x8a   :  { %3817 = vmatmul.mubr.msk.f32.gmra.mrb[60].mxu0 %vm155_vm1, %v128_v14 }
  0x8b   :  { %3819 = vmatprep.mubr.msk.f32.mxu0 %vm155_vm1, %v129_v15 }
  0x8e   :  { %3820 = vmatmul.mubr.msk.f32.gmra.mrb[62].mxu0 %vm155_vm1, %v130_v16 }
  0xe5   :  { %v3728_v20 = vpop.f32.mrb[0].mxu0 }
  0xe6   :  { %v466_v21 = vpop.f32.mrb[1].mxu0  ;;  %v472_v49 = vadd.f32 %v3728_v20, %v4761_v45 }
  0xe7   :  { %v467_v50 = vadd.f32 %v4761_v45, %v466_v21 }
  0xe8   :  { %v3824_v31 = vpop.f32.mrb[0].mxu1  ;;  %vm866_vm2 = vcmp.ge.f32.partialorder %v472_v49, 0.0  ;;  %v947_v62 = vmul.f32 %v4773_v52, %v472_v49 }
  0xe9   :  { %v3731_v24 = vpop.f32.mrb[2].mxu0  ;;  %v786_v32 = vpop.f32.mrb[1].mxu1  ;;  %vm865_vm3 = vcmp.ge.f32.partialorder %v467_v50, 0.0  ;;  %v946_v0 = vmul.f32 %v4773_v52, %v467_v50  ;;  %v792_v7 = vadd.f32 %v3824_v31, %v4761_v45 }
  0xea   :  { %v476_v26 = vpop.f32.mrb[3].mxu0  ;;  %v482_v53 = vadd.f32 %v3731_v24, %v4761_v45  ;;  %v4805_v11 = vsel %vm866_vm2, %v472_v49, %v947_v62  ;;  %v787_v12 = vadd.f32 %v4761_v45, %v786_v32 }
  0xeb   :  { %v477_v54 = vadd.f32 %v4761_v45, %v476_v26  ;;  %v4811_v14 = vsel %vm865_vm3, %v467_v50, %v946_v0  ;;  %v1011_v23 = vmul.f32 %v4773_v52, %v792_v7  ;;  %vm930_vm10 = vcmp.ge.f32.partialorder %v792_v7, 0.0 }
  0xec   :  { %v4738_v35 = vpop.f32.mrb[2].mxu1  ;;  %vm868_vm4 = vcmp.ge.f32.partialorder %v482_v53, 0.0  ;;  %v949_v1 = vmul.f32 %v4773_v52, %v482_v53  ;;  %vm929_vm12 = vcmp.ge.f32.partialorder %v787_v12, 0.0  ;;  %v1010_v49 = vmul.f32 %v4773_v52, %v787_v12 }
  0xed   :  { %v3734_v27 = vpop.f32.mrb[4].mxu0  ;;  %v4740_v36 = vpop.f32.mrb[3].mxu1  ;;  %v948_v2 = vmul.f32 %v4773_v52, %v477_v54  ;;  %vm867_vm5 = vcmp.ge.f32.partialorder %v477_v54, 0.0  ;;  %v802_v62 = vadd.f32 %v4738_v35, %v4761_v45 }
  0xee   :  { %v486_v28 = vpop.f32.mrb[5].mxu0  ;;  %v492_v56 = vadd.f32 %v3734_v27, %v4761_v45  ;;  %v4814_v15 = vsel %vm868_vm4, %v482_v53, %v949_v1 }
  0xef   :  { %v487_v57 = vadd.f32 %v4761_v45, %v486_v28  ;;  %v4817_v16 = vsel %vm867_vm5, %v477_v54, %v948_v2  ;;  %vm932_vm3 = vcmp.ge.f32.partialorder %v802_v62, 0.0 }
  0xf0   :  { %v4746_v39 = vpop.f32.mrb[4].mxu1  ;;  %v951_v4 = vmul.f32 %v4773_v52, %v492_v56  ;;  %vm870_vm6 = vcmp.ge.f32.partialorder %v492_v56, 0.0 }
  0xf1   :  { %v3737_v29 = vpop.f32.mrb[6].mxu0  ;;  %v4748_v40 = vpop.f32.mrb[5].mxu1  ;;  %v950_v5 = vmul.f32 %v4773_v52, %v487_v57  ;;  %vm869_vm7 = vcmp.ge.f32.partialorder %v487_v57, 0.0 }
  0xf2   :  { %v496_v30 = vpop.f32.mrb[7].mxu0  ;;  %v502_v59 = vadd.f32 %v3737_v29, %v4761_v45  ;;  %v4820_v19 = vsel %vm870_vm6, %v492_v56, %v951_v4  ;;  %v4845_v56 = vsel %vm930_vm10, %v792_v7, %v1011_v23  ;;  %v4860_v7 = vsel %vm929_vm12, %v787_v12, %v1010_v49 }
  0xf3   :  { %v497_v60 = vadd.f32 %v4761_v45, %v496_v30  ;;  %v4822_v20 = vsel %vm869_vm7, %v487_v57, %v950_v5 }
  0xf4   :  { %v4754_v43 = vpop.f32.mrb[6].mxu1  ;;  %v953_v8 = vmul.f32 %v4773_v52, %v502_v59  ;;  %vm872_vm8 = vcmp.ge.f32.partialorder %v502_v59, 0.0 }
  0xf5   :  { %v3740_v33 = vpop.f32.mrb[8].mxu0  ;;  %v4756_v44 = vpop.f32.mrb[7].mxu1  ;;  %v952_v9 = vmul.f32 %v4773_v52, %v497_v60  ;;  %vm871_vm9 = vcmp.ge.f32.partialorder %v497_v60, 0.0 }
  0xf6   :  { %v4736_v34 = vpop.f32.mrb[9].mxu0  ;;  %v512_v17 = vadd.f32 %v3740_v33, %v4761_v45  ;;  %v4826_v24 = vsel %vm872_vm8, %v502_v59, %v953_v8 }
  0xf7   :  { %v4828_v26 = vsel %vm871_vm9, %v497_v60, %v952_v9  ;;  %v507_v29 = vadd.f32 %v4761_v45, %v4736_v34 }
  0xf8   :  { %v4767_v48 = vpop.f32.mrb[8].mxu1  ;;  %vm874_vm13 = vcmp.ge.f32.partialorder %v512_v17, 0.0  ;;  %v955_v50 = vmul.f32 %v4773_v52, %v512_v17 }
  0xf9   :  { %v4742_v37 = vpop.f32.mrb[10].mxu0  ;;  %v4771_v51 = vpop.f32.mrb[9].mxu1  ;;  %vm873_vm15 = vcmp.ge.f32.partialorder %v507_v29, 0.0  ;;  %v954_v2 = vmul.f32 %v4773_v52, %v507_v29 }
  0xfa   :  { %v4744_v38 = vpop.f32.mrb[11].mxu0  ;;  %v4863_v8 = vsel %vm874_vm13, %v512_v17, %v955_v50 }
  0xfb   :  { %v4887_v49 = vsel %vm873_vm15, %v507_v29, %v954_v2 }
  0xfc   :  { %v4785_v61 = vpop.f32.mrb[10].mxu1 }
  0xfd   :  { %v4750_v41 = vpop.f32.mrb[12].mxu0  ;;  %v4788_v63 = vpop.f32.mrb[11].mxu1 }
  0xfe   :  { %v4752_v42 = vpop.f32.mrb[13].mxu0 }
 0x100   :  { %v4802_v10 = vpop.f32.mrb[12].mxu1 }
 0x101   :  { %v4763_v46 = vpop.f32.mrb[14].mxu0  ;;  %v4808_v13 = vpop.f32.mrb[13].mxu1 }
 0x102   :  { %v4765_v47 = vpop.f32.mrb[15].mxu0 }
 0x104   :  { %v4831_v28 = vpop.f32.mrb[14].mxu1 }
 0x105   :  { %v4777_v55 = vpop.f32.mrb[16].mxu0  ;;  %5918 = vst [vmem:[#allocation9_spill] sm:$0xff] %v4831_v28  ;;  %v4836_v31 = vpop.f32.mrb[15].mxu1 }
 0x106   :  { %v4781_v58 = vpop.f32.mrb[17].mxu0  ;;  %5919 = vst [vmem:[#allocation10_spill] sm:$0xff] %v4836_v31  ;;  %v552_v31 = vadd.f32 %v4777_v55, %v4761_v45 }
 0x109   :  { %v4793_v3 = vpop.f32.mrb[18].mxu0 }
 0x10a   :  { %v4797_v6 = vpop.f32.mrb[19].mxu0 }
 0x10d   :  { %v3758_v18 = vpop.f32.mrb[20].mxu0 }
 0x10e   :  { %v572_v21 = vadd.f32 %v3758_v18, %v4761_v45  ;;  %v566_v22 = vpop.f32.mrb[21].mxu0 }
 0x10f   :  { %v567_v27 = vadd.f32 %v4761_v45, %v566_v22  ;;  %v522_v22 = vadd.f32 %v4742_v37, %v4761_v45 }
 0x110   :  { %vm886_vm11 = vcmp.ge.f32.partialorder %v572_v21, 0.0  ;;  %v967_v30 = vmul.f32 %v4773_v52, %v572_v21 }
 0x111   :  { %vm885_vm14 = vcmp.ge.f32.partialorder %v567_v27, 0.0  ;;  %v966_v32 = vmul.f32 %v4773_v52, %v567_v27  ;;  %v3761_v33 = vpop.f32.mrb[22].mxu0  ;;  %vm876_vm5 = vcmp.ge.f32.partialorder %v522_v22, 0.0 }
 0x112   :  { %v4841_v53 = vsel %vm886_vm11, %v572_v21, %v967_v30  ;;  %v582_v54 = vadd.f32 %v3761_v33, %v4761_v45  ;;  %v576_v34 = vpop.f32.mrb[23].mxu0  ;;  %v4870_v21 = vadd.f32 %v4761_v45, %v4740_v36  ;;  %v517_v36 = vadd.f32 %v4761_v45, %v4744_v38 }
 0x113   :  { %v4849_v59 = vsel %vm885_vm14, %v567_v27, %v966_v32  ;;  %v577_v60 = vadd.f32 %v4761_v45, %v576_v34  ;;  %v1013_v33 = vmul.f32 %v4773_v52, %v802_v62  ;;  %v957_v38 = vmul.f32 %v4773_v52, %v522_v22 }
 0x114   :  { %vm888_vm0 = vcmp.ge.f32.partialorder %v582_v54, 0.0  ;;  %v969_v1 = vmul.f32 %v4773_v52, %v582_v54  ;;  %vm875_vm8 = vcmp.ge.f32.partialorder %v517_v36, 0.0 }
 0x115   :  { %vm887_vm1 = vcmp.ge.f32.partialorder %v577_v60, 0.0  ;;  %v968_v4 = vmul.f32 %v4773_v52, %v577_v60  ;;  %v3764_v5 = vpop.f32.mrb[24].mxu0 }
 0x116   :  { %v4865_v35 = vsel %vm888_vm0, %v582_v54, %v969_v1  ;;  %v592_v9 = vadd.f32 %v3764_v5, %v4761_v45  ;;  %v586_v18 = vpop.f32.mrb[25].mxu0  ;;  %v4915_v1 = vsel %vm876_vm5, %v522_v22, %v957_v38  ;;  %v542_v22 = vadd.f32 %v4763_v46, %v4761_v45 }
 0x117   :  { %v4876_v12 = vsel %vm887_vm1, %v577_v60, %v968_v4  ;;  %v587_v17 = vadd.f32 %v4761_v45, %v586_v18  ;;  %v4894_v60 = vmul.f32 %v4773_v52, %v4870_v21 }
 0x118   :  { %vm890_vm2 = vcmp.ge.f32.partialorder %v592_v9, 0.0  ;;  %v971_v30 = vmul.f32 %v4773_v52, %v592_v9  ;;  %vm880_vm14 = vcmp.ge.f32.partialorder %v542_v22, 0.0 }
 0x119   :  { %vm889_vm4 = vcmp.ge.f32.partialorder %v587_v17, 0.0  ;;  %v970_v37 = vmul.f32 %v4773_v52, %v587_v17  ;;  %v3767_v32 = vpop.f32.mrb[26].mxu0 }
 0x11a   :  { %v4889_v50 = vsel %vm890_vm2, %v592_v9, %v971_v30  ;;  %v602_v54 = vadd.f32 %v3767_v32, %v4761_v45  ;;  %v596_v34 = vpop.f32.mrb[27].mxu0  ;;  %v956_v9 = vmul.f32 %v4773_v52, %v517_v36  ;;  %v4908_v32 = vsel %vm932_vm3, %v802_v62, %v1013_v33 }
 0x11b   :  { %v4899_v4 = vsel %vm889_vm4, %v587_v17, %v970_v37  ;;  %v597_v5 = vadd.f32 %v4761_v45, %v596_v34  ;;  %v532_v17 = vadd.f32 %v4750_v41, %v4761_v45  ;;  %v527_v62 = vadd.f32 %v4761_v45, %v4752_v42 }
 0x11c   :  { %vm892_vm6 = vcmp.ge.f32.partialorder %v602_v54, 0.0  ;;  %v973_v2 = vmul.f32 %v4773_v52, %v602_v54  ;;  %vm882_vm3 = vcmp.ge.f32.partialorder %v552_v31, 0.0 }
 0x11d   :  { %vm891_vm7 = vcmp.ge.f32.partialorder %v597_v5, 0.0  ;;  %v972_v18 = vmul.f32 %v4773_v52, %v597_v5  ;;  %v3770_v30 = vpop.f32.mrb[28].mxu0  ;;  %vm878_vm11 = vcmp.ge.f32.partialorder %v532_v17, 0.0  ;;  %vm877_vm12 = vcmp.ge.f32.partialorder %v527_v62, 0.0 }
 0x11e   :  { %v4912_v37 = vsel %vm892_vm6, %v602_v54, %v973_v2  ;;  %v612_v34 = vadd.f32 %v3770_v30, %v4761_v45  ;;  %v606_v29 = vpop.f32.mrb[29].mxu0  ;;  %v4927_v54 = vsel %vm875_vm8, %v517_v36, %v956_v9  ;;  %v959_v30 = vmul.f32 %v4773_v52, %v532_v17 }
 0x11f   :  { %v4919_v23 = vsel %vm891_vm7, %v597_v5, %v972_v18  ;;  %v607_v0 = vadd.f32 %v4761_v45, %v606_v29  ;;  %5920 = vst [vmem:[#allocation11_spill] sm:$0xff] %v4927_v54  ;;  %v537_v29 = vadd.f32 %v4761_v45, %v4765_v47  ;;  %v961_v36 = vmul.f32 %v4773_v52, %v542_v22 }
 0x120   :  { %vm894_vm9 = vcmp.ge.f32.partialorder %v612_v34, 0.0  ;;  %v975_v33 = vmul.f32 %v4773_v52, %v612_v34  ;;  %vm931_vm7 = vcmp.ge.f32.partialorder %v4870_v21, 0.0 }
 0x121   :  { %vm893_vm10 = vcmp.ge.f32.partialorder %v607_v0, 0.0  ;;  %v974_v38 = vmul.f32 %v4773_v52, %v607_v0  ;;  %v3773_v5 = vpop.f32.mrb[30].mxu0  ;;  %vm879_vm0 = vcmp.ge.f32.partialorder %v537_v29, 0.0  ;;  %v960_v41 = vmul.f32 %v4773_v52, %v537_v29 }
 0x122   :  { %v4934_v42 = vsel %vm894_vm9, %v612_v34, %v975_v33  ;;  %v622_v2 = vadd.f32 %v3773_v5, %v4761_v45  ;;  %v616_v18 = vpop.f32.mrb[31].mxu0  ;;  %v958_v34 = vmul.f32 %v4773_v52, %v527_v62  ;;  %v4973_v55 = vsel %vm880_vm14, %v542_v22, %v961_v36 }
 0x123   :  { %v4940_v9 = vsel %vm893_vm10, %v607_v0, %v974_v38  ;;  %v617_v46 = vadd.f32 %v4761_v45, %v616_v18  ;;  %v963_v36 = vmul.f32 %v4773_v52, %v552_v31 }
 0x124   :  { %vm896_vm13 = vcmp.ge.f32.partialorder %v622_v2, 0.0  ;;  %v977_v47 = vmul.f32 %v4773_v52, %v622_v2 }
 0x125   :  { %vm895_vm15 = vcmp.ge.f32.partialorder %v617_v46, 0.0  ;;  %v976_v33 = vmul.f32 %v4773_v52, %v617_v46  ;;  %v3776_v5 = vpop.f32.mrb[32].mxu0 }
 0x126   :  { %v4949_v0 = vsel %vm896_vm13, %v622_v2, %v977_v47  ;;  %v632_v38 = vadd.f32 %v3776_v5, %v4761_v45  ;;  %v626_v18 = vpop.f32.mrb[33].mxu0  ;;  %v4964_v47 = vsel %vm878_vm11, %v532_v17, %v959_v30  ;;  %v547_v5 = vadd.f32 %v4761_v45, %v4781_v58 }
 0x127   :  { %v4955_v57 = vsel %vm895_vm15, %v617_v46, %v976_v33  ;;  %v627_v25 = vadd.f32 %v4761_v45, %v626_v18  ;;  %v4970_v18 = vsel %vm877_vm12, %v527_v62, %v958_v34  ;;  %v4979_v17 = vsel %vm879_vm0, %v537_v29, %v960_v41 }
 0x128   :  { %5921 = vst [vmem:[#allocation12_spill] sm:$0xff] %v4955_v57  ;;  %vm898_vm1 = vcmp.ge.f32.partialorder %v632_v38, 0.0  ;;  %v979_v2 = vmul.f32 %v4773_v52, %v632_v38  ;;  %5922 = vst [vmem:[#allocation13_spill] sm:$0xff] %v4979_v17  ;;  %v962_v34 = vmul.f32 %v4773_v52, %v547_v5  ;;  %vm881_vm6 = vcmp.ge.f32.partialorder %v547_v5, 0.0 }
 0x129   :  { %vm897_vm2 = vcmp.ge.f32.partialorder %v627_v25, 0.0  ;;  %v978_v46 = vmul.f32 %v4773_v52, %v627_v25  ;;  %v3779_v33 = vpop.f32.mrb[34].mxu0 }
 0x12a   :  { %v4975_v28 = vsel %vm898_vm1, %v632_v38, %v979_v2  ;;  %v642_v27 = vadd.f32 %v3779_v33, %v4761_v45  ;;  %v636_v57 = vpop.f32.mrb[35].mxu0 }
 0x12b   :  { %v4983_v30 = vsel %vm897_vm2, %v627_v25, %v978_v46  ;;  %v637_v54 = vadd.f32 %v4761_v45, %v636_v57  ;;  %v562_v25 = vadd.f32 %v4793_v3, %v4761_v45  ;;  %v557_v46 = vadd.f32 %v4761_v45, %v4797_v6 }
 0x12c   :  { %vm900_vm4 = vcmp.ge.f32.partialorder %v642_v27, 0.0  ;;  %v981_v22 = vmul.f32 %v4773_v52, %v642_v27  ;;  %v5013_v6 = vsel %vm881_vm6, %v547_v5, %v962_v34 }
 0x12d   :  { %vm899_vm5 = vcmp.ge.f32.partialorder %v637_v54, 0.0  ;;  %v980_v41 = vmul.f32 %v4773_v52, %v637_v54  ;;  %v3782_v29 = vpop.f32.mrb[36].mxu0  ;;  %5925 = vst [vmem:[#allocation16_spill] sm:$0xff] %v5013_v6  ;;  %vm884_vm10 = vcmp.ge.f32.partialorder %v562_v25, 0.0  ;;  %v964_v17 = vmul.f32 %v4773_v52, %v557_v46 }
 0x12e   :  { %v4994_v57 = vsel %vm900_vm4, %v642_v27, %v981_v22  ;;  %v652_v38 = vadd.f32 %v3782_v29, %v4761_v45  ;;  %v646_v2 = vpop.f32.mrb[37].mxu0  ;;  %v812_v22 = vadd.f32 %v4746_v39, %v4761_v45  ;;  %v5011_v29 = vsel %vm882_vm3, %v552_v31, %v963_v36 }
 0x12f   :  { %v5002_v62 = vsel %vm899_vm5, %v637_v54, %v980_v41  ;;  %v647_v58 = vadd.f32 %v4761_v45, %v646_v2  ;;  %5924 = vst [vmem:[#allocation15_spill] sm:$0xff] %v5011_v29  ;;  %v965_v2 = vmul.f32 %v4773_v52, %v562_v25  ;;  %vm883_vm11 = vcmp.ge.f32.partialorder %v557_v46, 0.0 }
 0x130   :  { %5923 = vst [vmem:[#allocation14_spill] sm:$0xff] %v5002_v62  ;;  %vm902_vm8 = vcmp.ge.f32.partialorder %v652_v38, 0.0  ;;  %v983_v27 = vmul.f32 %v4773_v52, %v652_v38  ;;  %vm934_vm14 = vcmp.ge.f32.partialorder %v812_v22, 0.0  ;;  %v1015_v36 = vmul.f32 %v4773_v52, %v812_v22 }
 0x131   :  { %vm901_vm9 = vcmp.ge.f32.partialorder %v647_v58, 0.0  ;;  %v982_v54 = vmul.f32 %v4773_v52, %v647_v58  ;;  %v3785_v41 = vpop.f32.mrb[38].mxu0 }
 0x132   :  { %v5017_v33 = vsel %vm902_vm8, %v652_v38, %v983_v27  ;;  %v662_v3 = vadd.f32 %v3785_v41, %v4761_v45  ;;  %v656_v62 = vpop.f32.mrb[39].mxu0  ;;  %v807_v41 = vadd.f32 %v4761_v45, %v4748_v40 }
 0x133   :  { %5926 = vst [vmem:[#allocation17_spill] sm:$0xff] %v5017_v33  ;;  %v5023_v31 = vsel %vm901_vm9, %v647_v58, %v982_v54  ;;  %v657_v5 = vadd.f32 %v4761_v45, %v656_v62  ;;  %v5033_v58 = vsel %vm884_vm10, %v562_v25, %v965_v2  ;;  %v5056_v2 = vsel %vm931_vm7, %v4870_v21, %v4894_v60 }
 0x134   :  { %5927 = vst [vmem:[#allocation18_spill] sm:$0xff] %v5023_v31  ;;  %vm904_vm12 = vcmp.ge.f32.partialorder %v662_v3, 0.0  ;;  %v985_v34 = vmul.f32 %v4773_v52, %v662_v3  ;;  %v5039_v31 = vsel %vm883_vm11, %v557_v46, %v964_v17  ;;  %vm933_vm1 = vcmp.ge.f32.partialorder %v807_v41, 0.0 }
 0x135   :  { %vm903_vm13 = vcmp.ge.f32.partialorder %v657_v5, 0.0  ;;  %v984_v38 = vmul.f32 %v4773_v52, %v657_v5  ;;  %v3788_v27 = vpop.f32.mrb[40].mxu0  ;;  %v5069_v21 = vsel %vm934_vm14, %v812_v22, %v1015_v36 }
 0x136   :  { %v5035_v54 = vsel %vm904_vm12, %v662_v3, %v985_v34  ;;  %v672_v62 = vadd.f32 %v3788_v27, %v4761_v45  ;;  %v666_v39 = vpop.f32.mrb[41].mxu0  ;;  %v822_v3 = vadd.f32 %v4754_v43, %v4761_v45  ;;  %v1014_v43 = vmul.f32 %v4773_v52, %v807_v41 }
 0x137   :  { %v5043_v33 = vsel %vm903_vm13, %v657_v5, %v984_v38  ;;  %v667_v29 = vadd.f32 %v4761_v45, %v666_v39  ;;  %v817_v39 = vadd.f32 %v4761_v45, %v4756_v44  ;;  %v5929_v27 = vmax.f32 %v4805_v11, %v4841_v53 }
 0x138   :  { %5928 = vst [vmem:[#allocation19_spill] sm:$0xff] %v5043_v33  ;;  %vm906_vm15 = vcmp.ge.f32.partialorder %v672_v62, 0.0  ;;  %v987_v25 = vmul.f32 %v4773_v52, %v672_v62  ;;  %v5930_v44 = vmax.f32 %v4811_v14, %v4849_v59  ;;  %vm936_vm3 = vcmp.ge.f32.partialorder %v822_v3, 0.0 }
 0x139   :  { %vm905_vm0 = vcmp.ge.f32.partialorder %v667_v29, 0.0  ;;  %v986_v17 = vmul.f32 %v4773_v52, %v667_v29  ;;  %v3791_v46 = vpop.f32.mrb[42].mxu0  ;;  %vm935_vm5 = vcmp.ge.f32.partialorder %v817_v39, 0.0  ;;  %v832_v14 = vadd.f32 %v4767_v48, %v4761_v45 }
 0x13a   :  { %v1067_v5 = vsel %vm906_vm15, %v672_v62, %v987_v25  ;;  %v682_v34 = vadd.f32 %v3791_v46, %v4761_v45  ;;  %v676_v38 = vpop.f32.mrb[43].mxu0  ;;  %v1016_v25 = vmul.f32 %v4773_v52, %v817_v39  ;;  %v5931_v59 = vmax.f32 %v4814_v15, %v4865_v35 }
 0x13b   :  { %v5065_v40 = vmax.f32 %v5929_v27, %v1067_v5  ;;  %v1066_v6 = vsel %vm905_vm0, %v667_v29, %v986_v17  ;;  %v677_v33 = vadd.f32 %v4761_v45, %v676_v38  ;;  %v1017_v29 = vmul.f32 %v4773_v52, %v822_v3 }
 0x13c   :  { %v5074_v60 = vmax.f32 %v5930_v44, %v1066_v6  ;;  %vm908_vm2 = vcmp.ge.f32.partialorder %v682_v34, 0.0  ;;  %v989_v62 = vmul.f32 %v4773_v52, %v682_v34  ;;  %v827_v38 = vadd.f32 %v4761_v45, %v4771_v51 }
 0x13d   :  { %vm907_vm4 = vcmp.ge.f32.partialorder %v677_v33, 0.0  ;;  %v988_v11 = vmul.f32 %v4773_v52, %v677_v33  ;;  %v3794_v53 = vpop.f32.mrb[44].mxu0  ;;  %v1094_v48 = vsel %vm933_vm1, %v807_v41, %v1014_v43  ;;  %vm938_vm8 = vcmp.ge.f32.partialorder %v832_v14, 0.0 }
 0x13e   :  { %v1069_v17 = vsel %vm908_vm2, %v682_v34, %v989_v62  ;;  %v692_v22 = vadd.f32 %v3794_v53, %v4761_v45  ;;  %v686_v36 = vpop.f32.mrb[45].mxu0  ;;  %v5932_v34 = vmax.f32 %v4817_v16, %v4876_v12  ;;  %v5102_v62 = vsel %vm935_vm5, %v817_v39, %v1016_v25 }
 0x13f   :  { %v5086_v6 = vmax.f32 %v5931_v59, %v1069_v17  ;;  %v1068_v46 = vsel %vm907_vm4, %v677_v33, %v988_v11  ;;  %v687_v5 = vadd.f32 %v4761_v45, %v686_v36  ;;  %v5100_v33 = vsel %vm936_vm3, %v822_v3, %v1017_v29 }
 0x140   :  { %v5094_v27 = vmax.f32 %v5932_v34, %v1068_v46  ;;  %vm910_vm6 = vcmp.ge.f32.partialorder %v692_v22, 0.0  ;;  %v991_v44 = vmul.f32 %v4773_v52, %v692_v22  ;;  %v1019_v12 = vmul.f32 %v4773_v52, %v832_v14 }
 0x141   :  { %vm909_vm7 = vcmp.ge.f32.partialorder %v687_v5, 0.0  ;;  %v990_v15 = vmul.f32 %v4773_v52, %v687_v5  ;;  %v3797_v35 = vpop.f32.mrb[46].mxu0  ;;  %v5933_v53 = vmax.f32 %v4820_v19, %v4889_v50  ;;  %vm937_vm9 = vcmp.ge.f32.partialorder %v827_v38, 0.0 }
 0x142   :  { %v1071_v51 = vsel %vm910_vm6, %v692_v22, %v991_v44  ;;  %v702_v11 = vadd.f32 %v3797_v35, %v4761_v45  ;;  %v696_v16 = vpop.f32.mrb[47].mxu0  ;;  %v5934_v3 = vmax.f32 %v4822_v20, %v4899_v4  ;;  %v1018_v25 = vmul.f32 %v4773_v52, %v827_v38 }
 0x143   :  { %v1131_v41 = vmax.f32 %v5933_v53, %v1071_v51  ;;  %v1070_v43 = vsel %vm909_vm7, %v687_v5, %v990_v15  ;;  %v697_v17 = vadd.f32 %v4761_v45, %v696_v16  ;;  %v842_v36 = vadd.f32 %v4785_v61, %v4761_v45 }
 0x144   :  { %v1130_v39 = vmax.f32 %v5934_v3, %v1070_v43  ;;  %vm912_vm10 = vcmp.ge.f32.partialorder %v702_v11, 0.0  ;;  %v993_v29 = vmul.f32 %v4773_v52, %v702_v11  ;;  %v5126_v5 = vsel %vm938_vm8, %v832_v14, %v1019_v12 }
 0x145   :  { %v5116_v22 = vmax.f32 %v1131_v41, %v4845_v56  ;;  %vm911_vm11 = vcmp.ge.f32.partialorder %v697_v17, 0.0  ;;  %v992_v19 = vmul.f32 %v4773_v52, %v697_v17  ;;  %v3800_v50 = vpop.f32.mrb[48].mxu0  ;;  %v5935_v56 = vmax.f32 %v4826_v24, %v4912_v37 }
 0x146   :  { %v5122_v59 = vmax.f32 %v1130_v39, %v4860_v7  ;;  %v1073_v20 = vsel %vm912_vm10, %v702_v11, %v993_v29  ;;  %v712_v4 = vadd.f32 %v3800_v50, %v4761_v45  ;;  %v706_v46 = vpop.f32.mrb[49].mxu0  ;;  %v837_v61 = vadd.f32 %v4761_v45, %v4788_v63 }
 0x147   :  { %v1133_v34 = vmax.f32 %v5935_v56, %v1073_v20  ;;  %v1072_v44 = vsel %vm911_vm11, %v697_v17, %v992_v19  ;;  %v707_v15 = vadd.f32 %v4761_v45, %v706_v46  ;;  %v5936_v7 = vmax.f32 %v4828_v26, %v4919_v23 }
 0x148   :  { %vm914_vm12 = vcmp.ge.f32.partialorder %v712_v4, 0.0  ;;  %v995_v51 = vmul.f32 %v4773_v52, %v712_v4  ;;  %v1098_v14 = vsel %vm937_vm9, %v827_v38, %v1018_v25  ;;  %vm940_vm14 = vcmp.ge.f32.partialorder %v842_v36, 0.0 }
 0x149   :  { %v1132_v35 = vmax.f32 %v5936_v7, %v1072_v44  ;;  %v5140_v11 = vmax.f32 %v1133_v34, %v4908_v32  ;;  %vm913_vm13 = vcmp.ge.f32.partialorder %v707_v15, 0.0  ;;  %v994_v24 = vmul.f32 %v4773_v52, %v707_v15  ;;  %v3803_v37 = vpop.f32.mrb[50].mxu0  ;;  %v5940_v34 = vld [vmem:[#allocation11_spill] sm:$0xff] }
 0x14a   :  { %v1075_v63 = vsel %vm914_vm12, %v712_v4, %v995_v51  ;;  %v722_v26 = vadd.f32 %v3803_v37, %v4761_v45  ;;  %v716_v23 = vpop.f32.mrb[51].mxu0  ;;  %v1021_v12 = vmul.f32 %v4773_v52, %v842_v36  ;;  %v5937_v38 = vmax.f32 %v4863_v8, %v4934_v42 }
 0x14b   :  { %v5144_v16 = vmax.f32 %v1132_v35, %v5056_v2  ;;  %v1074_v32 = vsel %vm913_vm13, %v707_v15, %v994_v24  ;;  %v717_v41 = vadd.f32 %v4761_v45, %v716_v23  ;;  %vm939_vm15 = vcmp.ge.f32.partialorder %v837_v61, 0.0 }
 0x14c   :  { %v1135_v53 = vmax.f32 %v5937_v38, %v1075_v63  ;;  %v5938_v43 = vmax.f32 %v4887_v49, %v4940_v9  ;;  %vm916_vm0 = vcmp.ge.f32.partialorder %v722_v26, 0.0  ;;  %v997_v2 = vmul.f32 %v4773_v52, %v722_v26 }
 0x14d   :  { %v1020_v3 = vmul.f32 %v4773_v52, %v837_v61  ;;  %vm915_vm1 = vcmp.ge.f32.partialorder %v717_v41, 0.0  ;;  %v996_v8 = vmul.f32 %v4773_v52, %v717_v41  ;;  %v3806_v42 = vpop.f32.mrb[52].mxu0  ;;  %v852_v29 = vadd.f32 %v4802_v10, %v4761_v45  ;;  %v5941_v10 = vld [vmem:[#allocation12_spill] sm:$0xff] }
 0x14e   :  { %v1134_v17 = vmax.f32 %v5938_v43, %v1074_v32  ;;  %v5158_v39 = vmax.f32 %v1135_v53, %v5069_v21  ;;  %v1077_v19 = vsel %vm916_vm0, %v722_v26, %v997_v2  ;;  %v732_v49 = vadd.f32 %v3806_v42, %v4761_v45  ;;  %v726_v9 = vpop.f32.mrb[53].mxu0  ;;  %v5945_v32 = vld [vmem:[#allocation9_spill] sm:$0xff] }
 0x14f   :  { %v1101_v50 = vsel %vm940_vm14, %v842_v36, %v1021_v12  ;;  %v5939_v20 = vmax.f32 %v4915_v1, %v4949_v0  ;;  %v1076_v4 = vsel %vm915_vm1, %v717_v41, %v996_v8  ;;  %v727_v46 = vadd.f32 %v4761_v45, %v726_v9  ;;  %v5948_v9 = vld [vmem:[#allocation13_spill] sm:$0xff] }
 0x150   :  { %v5163_v25 = vmax.f32 %v1134_v17, %v1094_v48  ;;  %v847_v56 = vadd.f32 %v4761_v45, %v4808_v13  ;;  %v5942_v48 = vmax.f32 %v5940_v34, %v5941_v10  ;;  %vm918_vm2 = vcmp.ge.f32.partialorder %v732_v49, 0.0 }
 0x151   :  { %v1137_v21 = vmax.f32 %v5939_v20, %v1077_v19  ;;  %v999_v15 = vmul.f32 %v4773_v52, %v732_v49  ;;  %v1100_v7 = vsel %vm939_vm15, %v837_v61, %v1020_v3  ;;  %vm917_vm3 = vcmp.ge.f32.partialorder %v727_v46, 0.0  ;;  %v3809_v0 = vpop.f32.mrb[54].mxu0  ;;  %v5947_v19 = vld [vmem:[#allocation10_spill] sm:$0xff] }
 0x152   :  { %v1136_v44 = vmax.f32 %v5942_v48, %v1076_v4  ;;  %v998_v1 = vmul.f32 %v4773_v52, %v727_v46  ;;  %vm942_vm4 = vcmp.ge.f32.partialorder %v852_v29, 0.0  ;;  %v742_v51 = vadd.f32 %v3809_v0, %v4761_v45  ;;  %v736_v24 = vpop.f32.mrb[55].mxu0  ;;  %v5949_v20 = vld [vmem:[#allocation14_spill] sm:$0xff]  ;;  %v5952_v0 = vld [vmem:[#allocation17_spill] sm:$0xff] }
 0x153   :  { %v5179_v36 = vmax.f32 %v1137_v21, %v5100_v33  ;;  %v1079_v13 = vsel %vm918_vm2, %v732_v49, %v999_v15  ;;  %v1023_v37 = vmul.f32 %v4773_v52, %v852_v29  ;;  %v5943_v61 = vmax.f32 %v4964_v47, %v4975_v28 }
 0x154   :  { %v5183_v35 = vmax.f32 %v1136_v44, %v5102_v62  ;;  %v1078_v33 = vsel %vm917_vm3, %v727_v46, %v998_v1  ;;  %v737_v26 = vadd.f32 %v4761_v45, %v736_v24  ;;  %vm941_vm5 = vcmp.ge.f32.partialorder %v847_v56, 0.0  ;;  %v5951_v1 = vld [vmem:[#allocation15_spill] sm:$0xff] }
 0x155   :  { %v1139_v63 = vmax.f32 %v5943_v61, %v1079_v13  ;;  %v5944_v23 = vmax.f32 %v4970_v18, %v4983_v30  ;;  %vm920_vm6 = vcmp.ge.f32.partialorder %v742_v51, 0.0  ;;  %v1001_v62 = vmul.f32 %v4773_v52, %v742_v51  ;;  %v3812_v47 = vpop.f32.mrb[56].mxu0  ;;  %v5955_v61 = vld [vmem:[#allocation18_spill] sm:$0xff] }
 0x156   :  { %v1022_v38 = vmul.f32 %v4773_v52, %v847_v56  ;;  %vm919_vm7 = vcmp.ge.f32.partialorder %v737_v26, 0.0  ;;  %v1000_v28 = vmul.f32 %v4773_v52, %v737_v26  ;;  %v862_v41 = vadd.f32 %v5945_v32, %v4761_v45  ;;  %v746_v30 = vpop.f32.mrb[57].mxu0 }
 0x157   :  { %v1138_v12 = vmax.f32 %v5944_v23, %v1078_v33  ;;  %v5197_v53 = vmax.f32 %v1139_v63, %v5126_v5  ;;  %v1081_v17 = vsel %vm920_vm6, %v742_v51, %v1001_v62  ;;  %v752_v18 = vadd.f32 %v3812_v47, %v4761_v45 }
 0x158   :  { %v1103_v2 = vsel %vm942_vm4, %v852_v29, %v1023_v37  ;;  %v5946_v3 = vmax.f32 %v4973_v55, %v4994_v57  ;;  %v1080_v8 = vsel %vm919_vm7, %v737_v26, %v1000_v28  ;;  %v747_v42 = vadd.f32 %v4761_v45, %v746_v30  ;;  %v5954_v37 = vld [vmem:[#allocation16_spill] sm:$0xff] }
 0x159   :  { %v5202_v43 = vmax.f32 %v1138_v12, %v1098_v14  ;;  %v857_v49 = vadd.f32 %v4761_v45, %v5947_v19  ;;  %v5950_v14 = vmax.f32 %v5948_v9, %v5949_v20  ;;  %vm922_vm8 = vcmp.ge.f32.partialorder %v752_v18, 0.0  ;;  %v3815_v57 = vpop.f32.mrb[58].mxu0 }
 0x15a   :  { %v1141_v5 = vmax.f32 %v5946_v3, %v1081_v17  ;;  %v1003_v4 = vmul.f32 %v4773_v52, %v752_v18  ;;  %v1102_v46 = vsel %vm941_vm5, %v847_v56, %v1022_v38  ;;  %vm921_vm9 = vcmp.ge.f32.partialorder %v747_v42, 0.0  ;;  %v756_v44 = vpop.f32.mrb[59].mxu0 }
 0x15b   :  { %v1140_v21 = vmax.f32 %v5950_v14, %v1080_v8  ;;  %v1002_v55 = vmul.f32 %v4773_v52, %v747_v42  ;;  %vm944_vm10 = vcmp.ge.f32.partialorder %v862_v41, 0.0  ;;  %v762_v48 = vadd.f32 %v3815_v57, %v4761_v45 }
 0x15c   :  { %v5217_v29 = vmax.f32 %v1141_v5, %v1101_v50  ;;  %v1083_v10 = vsel %vm922_vm8, %v752_v18, %v1003_v4  ;;  %v1025_v15 = vmul.f32 %v4773_v52, %v862_v41  ;;  %v5953_v13 = vmax.f32 %v5951_v1, %v5952_v0  ;;  %v5958_v5 = vld [vmem:[#allocation19_spill] sm:$0xff] }
 0x15d   :  { %v5220_v34 = vmax.f32 %v1140_v21, %v1100_v7  ;;  %v1082_v56 = vsel %vm921_vm9, %v747_v42, %v1002_v55  ;;  %v757_v50 = vadd.f32 %v4761_v45, %v756_v44  ;;  %v1024_v24 = vmul.f32 %v4773_v52, %v857_v49  ;;  %v3818_v12 = vpop.f32.mrb[60].mxu0  ;;  %v3381_v0 = vld [vmem:[%s5896_s4 + $0x40] sm:$0xff] }
 0x15e   :  { %v1143_v51 = vmax.f32 %v5953_v13, %v1083_v10  ;;  %v5956_v63 = vmax.f32 %v5954_v37, %v5955_v61  ;;  %vm924_vm11 = vcmp.ge.f32.partialorder %v762_v48, 0.0  ;;  %v1005_v33 = vmul.f32 %v4773_v52, %v762_v48  ;;  %v766_v32 = vpop.f32.mrb[61].mxu0  ;;  %v3345_v10 = vld [vmem:[%s5896_s4 + $0x20] sm:$0xff]  ;;  %v3382_v13 = vld [vmem:[%s5896_s4 + $0x48] sm:$0xff] }
 0x15f   :  { %vm943_vm12 = vcmp.ge.f32.partialorder %v857_v49, 0.0  ;;  %vm923_vm13 = vcmp.ge.f32.partialorder %v757_v50, 0.0  ;;  %v1004_v23 = vmul.f32 %v4773_v52, %v757_v50  ;;  %v5239_v28 = vsel %vm944_vm10, %v862_v41, %v1025_v15  ;;  %v4133_v37 = vld [vmem:[%s5898_s6 + $0x48] ss:$16 sps:$4 sm:$0xff]   ;;  %v4123_v61 = vld [vmem:[%s5898_s6 + $0xa4] ss:$16 sps:$4 sm:$0xff]  }
 0x160   :  { %v1142_v7 = vmax.f32 %v5956_v63, %v1082_v56  ;;  %v5233_v26 = vmax.f32 %v1143_v51, %v1103_v2  ;;  %v1085_v38 = vsel %vm924_vm11, %v762_v48, %v1005_v33  ;;  %v772_v47 = vadd.f32 %v3818_v12, %v4761_v45  ;;  %v4120_v56 = vld [vmem:[%s5898_s6 + $0x84] ss:$16 sps:$4 sm:$0xff]   ;;  %v4138_v63 = vld [vmem:[%s5898_s6 + $0x6c] ss:$16 sps:$4 sm:$0xff]   ;;  %v4136_v33 = vld [vmem:[%s5898_s6 + $0x68] ss:$16 sps:$4 sm:$0xff]  }
 0x161   :  { %v5957_v17 = vmax.f32 %v5033_v58, %v5035_v54  ;;  %v1084_v30 = vsel %vm923_vm13, %v757_v50, %v1004_v23  ;;  %v1104_v2 = vsel %vm943_vm12, %v857_v49, %v1024_v24  ;;  %v767_v3 = vadd.f32 %v4761_v45, %v766_v32  ;;  %v3821_v58 = vpop.f32.mrb[62].mxu0  ;;  %v4135_v50 = vld [vmem:[%s5898_s6 + $0x4c] ss:$16 sps:$4 sm:$0xff]   ;;  %v4118_v24 = vld [vmem:[%s5898_s6 + $0x80] ss:$16 sps:$4 sm:$0xff]  }
 0x162   :  { %v5236_v62 = vmax.f32 %v1142_v7, %v1102_v46  ;;  %v5959_v8 = vmax.f32 %v5039_v31, %v5958_v5  ;;  %vm926_vm14 = vcmp.ge.f32.partialorder %v772_v47, 0.0  ;;  %v1007_v41 = vmul.f32 %v4773_v52, %v772_v47  ;;  %v776_v14 = vpop.f32.mrb[63].mxu0  ;;  %v4121_v7 = vld [vmem:[%s5898_s6 + $0xa0] ss:$16 sps:$4 sm:$0xff]  }
 0x163   :  { %v5245_v18 = vmax.f32 %v5957_v17, %v1085_v38  ;;  %vm925_vm15 = vcmp.ge.f32.partialorder %v767_v3, 0.0  ;;  %v1006_v9 = vmul.f32 %v4773_v52, %v767_v3  ;;  %v782_v49 = vadd.f32 %v3821_v58, %v4761_v45  ;;  %v4124_v23 = vld [vmem:[%s5898_s6 + $0xc0] ss:$16 sps:$4 sm:$0xff]  }
 0x164   :  { %v1144_v42 = vmax.f32 %v5959_v8, %v1084_v30  ;;  %v1087_v20 = vsel %vm926_vm14, %v772_v47, %v1007_v41  ;;  %vm1171_vm0 = vcmask 130048   ;;  %v777_v4 = vadd.f32 %v4761_v45, %v776_v14  ;;  %v5511_v12 = vld [vmem:[%s5897_s5] ss:$0 sm:$0xff]  ;;  %s4315_s5 = smov 64  }
 0x165   :  { %v1165_v19 = vmax.f32 %v5245_v18, %v5239_v28  ;;  %v1147_v31 = vmax.f32 %v5065_v40, %v1087_v20  ;;  %v1086_v21 = vsel %vm925_vm15, %v767_v3, %v1006_v9  ;;  %vm928_vm1 = vcmp.ge.f32.partialorder %v782_v49, 0.0  ;;  %v3346_v40 = vld [vmem:[%s5896_s4 + $0x28] sm:$0xff] }
 0x166   :  { %v5255_v54 = vmax.f32 %v1144_v42, %v1104_v2  ;;  %v1146_v46 = vmax.f32 %v5074_v60, %v1086_v21  ;;  %v1009_v55 = vmul.f32 %v4773_v52, %v782_v49  ;;  %vm927_vm2 = vcmp.ge.f32.partialorder %v777_v4, 0.0  ;;  %v4139_v21 = vld [vmem:[%s5898_s6 + $0xe0] ss:$16 sps:$4 sm:$0xff]  }
 0x167   :  { %v1008_v57 = vmul.f32 %v4773_v52, %v777_v4  ;;  %3850 = vmatprep.mubr.msk.f32.mxu1 %vm1171_vm0, %v1147_v31  ;;  %v4014_v15 = vpack.c.bf16 %v3346_v40, %v3345_v10  ;;  %v5960_v52 = vld [vmem:[#allocation8_spill] sm:$0xff]  ;;  %v4022_v51 = vpack.c.bf16 %v3382_v13, %v3381_v0  ;;  %v5513_v38 = vstv %s3225_s21  ;;  %s3216_s21 = sshll.u32 %s4319_s0, 4  ;;  %s3217_s21 = int_to_ptr.vmem [resolvable:$true] %s3216_s21 }
 0x168   :  { %v1089_v48 = vsel %vm928_vm1, %v782_v49, %v1009_v55  ;;  %v4144_v10 = vld [vmem:[%s5898_s6 + $0x8c] ss:$16 sps:$4 sm:$0xff]   ;;  %p4291_p6 = scmp.lt.s32.totalorder %s3217_s21, %s3217_s21 }
 0x169   :  { %v5271_v45 = vmax.f32 %v5086_v6, %v1089_v48  ;;  %v1088_v60 = vsel %vm927_vm2, %v777_v4, %v1008_v57  ;;  %v3363_v6 = vld [vmem:[%s5896_s4 + $0x30] sm:$0xff] }
 0x16a   :  { %v1148_v44 = vmax.f32 %v5094_v27, %v1088_v60  ;;  %v3364_v27 = vld [vmem:[%s5896_s4 + $0x38] sm:$0xff]  ;;  %v4141_v4 = vld [vmem:[%s5898_s6 + $0xe4] ss:$16 sps:$4 sm:$0xff]  }
 0x16b   :  { %v4018_v1 = vpack.c.bf16 %v3364_v27, %v3363_v6 }
 0x16c   :  { %3851 = vmatmul.mubr.msk.f32.vlgmr.msra.gmra.mrb[16].mxu1 %vm1171_vm0, %v1148_v44 }
 0x16d   :  { %4013 = vmatpush3.bf16.msra.mxu1 %v5960_v52  ;;  %3853 = vmatprep.mubr.msk.f32.mxu1 %vm1171_vm0, %v5271_v45 }
 0x16e   :  { %4015 = vmatprep.subr.bf16.mxu1 %v4014_v15 }
 0x170   :  { %3854 = vmatmul.mubr.msk.f32.gmra.mrb[18].mxu1 %vm1171_vm0, %v5122_v59 }
 0x171   :  { %3856 = vmatprep.mubr.msk.f32.mxu1 %vm1171_vm0, %v5116_v22 }
 0x174   :  { %3857 = vmatmul.mubr.msk.f32.gmra.mrb[20].mxu1 %vm1171_vm0, %v5144_v16 }
 0x175   :  { %3859 = vmatprep.mubr.msk.f32.mxu1 %vm1171_vm0, %v5140_v11 }
 0x178   :  { %3860 = vmatmul.mubr.msk.f32.gmra.mrb[22].mxu1 %vm1171_vm0, %v5163_v25 }
 0x179   :  { %3862 = vmatprep.mubr.msk.f32.mxu1 %vm1171_vm0, %v5158_v39 }
 0x17c   :  { %3863 = vmatmul.mubr.msk.f32.gmra.mrb[24].mxu1 %vm1171_vm0, %v5183_v35 }
 0x17d   :  { %3865 = vmatprep.mubr.msk.f32.mxu1 %vm1171_vm0, %v5179_v36 }
 0x180   :  { %3866 = vmatmul.mubr.msk.f32.gmra.mrb[26].mxu1 %vm1171_vm0, %v5202_v43 }
 0x181   :  { %3868 = vmatprep.mubr.msk.f32.mxu1 %vm1171_vm0, %v5197_v53 }
 0x184   :  { %3869 = vmatmul.mubr.msk.f32.gmra.mrb[28].mxu1 %vm1171_vm0, %v5220_v34 }
 0x185   :  { %3871 = vmatprep.mubr.msk.f32.mxu1 %vm1171_vm0, %v5217_v29 }
 0x188   :  { %3872 = vmatmul.mubr.msk.f32.gmra.mrb[30].mxu1 %vm1171_vm0, %v5236_v62 }
 0x189   :  { %3878 = vmatprep.mubr.msk.f32.mxu1 %vm1171_vm0, %v1146_v46  ;;  %v4142_v46 = vld [vmem:[%s5898_s6 + $0x88] ss:$16 sps:$4 sm:$0xff]  }
 0x18c   :  { %3879 = vmatmul.mubr.msk.f32.vlgmr.msra.gmra.mrb[16].mxu1 %vm1171_vm0, %v1147_v31 }
 0x18d   :  { %4017 = vmatpush3.bf16.msra.mxu1 %v4014_v15  ;;  %3881 = vmatprep.mubr.msk.f32.mxu1 %vm1171_vm0, %v1148_v44 }
 0x18e   :  { %4019 = vmatprep.subr.bf16.mxu1 %v4018_v1 }
 0x190   :  { %3882 = vmatmul.mubr.msk.f32.gmra.mrb[18].mxu1 %vm1171_vm0, %v5271_v45 }
 0x191   :  { %3884 = vmatprep.mubr.msk.f32.mxu1 %vm1171_vm0, %v5122_v59 }
 0x194   :  { %3885 = vmatmul.mubr.msk.f32.gmra.mrb[20].mxu1 %vm1171_vm0, %v5116_v22 }
 0x195   :  { %3887 = vmatprep.mubr.msk.f32.mxu1 %vm1171_vm0, %v5144_v16 }
 0x198   :  { %3888 = vmatmul.mubr.msk.f32.gmra.mrb[22].mxu1 %vm1171_vm0, %v5140_v11 }
 0x199   :  { %3890 = vmatprep.mubr.msk.f32.mxu1 %vm1171_vm0, %v5163_v25 }
 0x19c   :  { %3891 = vmatmul.mubr.msk.f32.gmra.mrb[24].mxu1 %vm1171_vm0, %v5158_v39 }
 0x19d   :  { %3893 = vmatprep.mubr.msk.f32.mxu1 %vm1171_vm0, %v5183_v35 }
 0x1a0   :  { %3894 = vmatmul.mubr.msk.f32.gmra.mrb[26].mxu1 %vm1171_vm0, %v5179_v36 }
 0x1a1   :  { %3896 = vmatprep.mubr.msk.f32.mxu1 %vm1171_vm0, %v5202_v43 }
 0x1a4   :  { %3897 = vmatmul.mubr.msk.f32.gmra.mrb[28].mxu1 %vm1171_vm0, %v5197_v53 }
 0x1a5   :  { %3899 = vmatprep.mubr.msk.f32.mxu1 %vm1171_vm0, %v5220_v34 }
 0x1a8   :  { %3900 = vmatmul.mubr.msk.f32.gmra.mrb[30].mxu1 %vm1171_vm0, %v5217_v29 }
 0x1a9   :  { %3906 = vmatprep.mubr.msk.f32.mxu1 %vm1171_vm0, %v1148_v44 }
 0x1ac   :  { %3907 = vmatmul.mubr.msk.f32.vlgmr.msra.gmra.mrb[16].mxu1 %vm1171_vm0, %v5271_v45 }
 0x1ad   :  { %4021 = vmatpush3.bf16.msra.mxu1 %v4018_v1  ;;  %3909 = vmatprep.mubr.msk.f32.mxu1 %vm1171_vm0, %v5122_v59  ;;  %v4145_v1 = vld [vmem:[%s5898_s6 + $0xa8] ss:$16 sps:$4 sm:$0xff]  }
 0x1ae   :  { %4023 = vmatprep.subr.bf16.mxu1 %v4022_v51 }
 0x1b0   :  { %3910 = vmatmul.mubr.msk.f32.gmra.mrb[18].mxu1 %vm1171_vm0, %v5116_v22 }
 0x1b1   :  { %3912 = vmatprep.mubr.msk.f32.mxu1 %vm1171_vm0, %v5144_v16 }
 0x1b4   :  { %3913 = vmatmul.mubr.msk.f32.gmra.mrb[20].mxu1 %vm1171_vm0, %v5140_v11 }
 0x1b5   :  { %3915 = vmatprep.mubr.msk.f32.mxu1 %vm1171_vm0, %v5163_v25 }
 0x1b8   :  { %3916 = vmatmul.mubr.msk.f32.gmra.mrb[22].mxu1 %vm1171_vm0, %v5158_v39 }
 0x1b9   :  { %3918 = vmatprep.mubr.msk.f32.mxu1 %vm1171_vm0, %v5183_v35 }
 0x1bc   :  { %3919 = vmatmul.mubr.msk.f32.gmra.mrb[24].mxu1 %vm1171_vm0, %v5179_v36 }
 0x1bd   :  { %3921 = vmatprep.mubr.msk.f32.mxu1 %vm1171_vm0, %v5202_v43 }
 0x1c0   :  { %3922 = vmatmul.mubr.msk.f32.gmra.mrb[26].mxu1 %vm1171_vm0, %v5197_v53 }
 0x1c1   :  { %3924 = vmatprep.mubr.msk.f32.mxu1 %vm1171_vm0, %v5220_v34 }
 0x1c4   :  { %3925 = vmatmul.mubr.msk.f32.gmra.mrb[28].mxu1 %vm1171_vm0, %v5217_v29 }
 0x1c5   :  { %3927 = vmatprep.mubr.msk.f32.mxu1 %vm1171_vm0, %v5236_v62 }
 0x1c8   :  { %3928 = vmatmul.mubr.msk.f32.gmra.mrb[30].mxu1 %vm1171_vm0, %v5233_v26 }
 0x1c9   :  { %3934 = vmatprep.mubr.msk.f32.mxu1 %vm1171_vm0, %v5271_v45  ;;  %v4147_v45 = vld [vmem:[%s5898_s6 + $0xac] ss:$16 sps:$4 sm:$0xff]  }
 0x1cc   :  { %3935 = vmatmul.mubr.msk.f32.vlgmr.msra.gmra.mrb[16].mxu1 %vm1171_vm0, %v5122_v59 }
 0x1cd   :  { %4025 = vmatpush3.bf16.msra.mxu1 %v4022_v51  ;;  %3937 = vmatprep.mubr.msk.f32.mxu1 %vm1171_vm0, %v5116_v22 }
 0x1d0   :  { %3938 = vmatmul.mubr.msk.f32.gmra.mrb[18].mxu1 %vm1171_vm0, %v5144_v16 }
 0x1d1   :  { %3940 = vmatprep.mubr.msk.f32.mxu1 %vm1171_vm0, %v5140_v11 }
 0x1d4   :  { %3941 = vmatmul.mubr.msk.f32.gmra.mrb[20].mxu1 %vm1171_vm0, %v5163_v25 }
 0x1d5   :  { %3943 = vmatprep.mubr.msk.f32.mxu1 %vm1171_vm0, %v5158_v39 }
 0x1d8   :  { %3944 = vmatmul.mubr.msk.f32.gmra.mrb[22].mxu1 %vm1171_vm0, %v5183_v35 }
 0x1d9   :  { %3946 = vmatprep.mubr.msk.f32.mxu1 %vm1171_vm0, %v5179_v36 }
 0x1dc   :  { %3947 = vmatmul.mubr.msk.f32.gmra.mrb[24].mxu1 %vm1171_vm0, %v5202_v43 }
 0x1dd   :  { %3949 = vmatprep.mubr.msk.f32.mxu1 %vm1171_vm0, %v5197_v53 }
 0x1e0   :  { %3950 = vmatmul.mubr.msk.f32.gmra.mrb[26].mxu1 %vm1171_vm0, %v5220_v34 }
 0x1e1   :  { %3952 = vmatprep.mubr.msk.f32.mxu1 %vm1171_vm0, %v5217_v29 }
 0x1e4   :  { %3953 = vmatmul.mubr.msk.f32.gmra.mrb[28].mxu1 %vm1171_vm0, %v5236_v62 }
 0x1e5   :  { %3955 = vmatprep.mubr.msk.f32.mxu1 %vm1171_vm0, %v5233_v26 }
 0x1e8   :  { %3956 = vmatmul.mubr.msk.f32.gmra.mrb[30].mxu1 %vm1171_vm0, %v5255_v54 }
 0x1e9   :  { %3962 = vmatprep.mubr.msk.f32.mxu1 %vm1171_vm0, %v5122_v59  ;;  %v4108_v59 = vld [vmem:[%s5898_s6 + $0x4] ss:$16 sps:$4 sm:$0xff]  }
 0x1ea   :  { %2331 = vmatprep.subr.bf16.mxu0 %v4108_v59 }
 0x1ec   :  { %3963 = vmatmul.mubr.msk.f32.vlgmr.msra.gmra.mrb[16].mxu1 %vm1171_vm0, %v5116_v22  ;;  %v4106_v22 = vld [vmem:[%s5898_s6] ss:$16 sps:$4 sm:$0xff]  }
 0x1ed   :  { %3965 = vmatprep.mubr.msk.f32.mxu1 %vm1171_vm0, %v5144_v16  ;;  %2332 = vmatpush1.bf16.msra.mxu0 %v4106_v22  ;;  %v4111_v16 = vld [vmem:[%s5898_s6 + $0x24] ss:$16 sps:$4 sm:$0xff]  }
 0x1ee   :  { %2333 = vmatprep.subr.bf16.mxu0 %v4111_v16 }
 0x1f0   :  { %3966 = vmatmul.mubr.msk.f32.gmra.mrb[18].mxu1 %vm1171_vm0, %v5140_v11  ;;  %v4109_v11 = vld [vmem:[%s5898_s6 + $0x20] ss:$16 sps:$4 sm:$0xff]  }
 0x1f1   :  { %3968 = vmatprep.mubr.msk.f32.mxu1 %vm1171_vm0, %v5163_v25  ;;  %2334 = vmatpush1.bf16.msra.mxu0 %v4109_v11  ;;  %v4112_v25 = vld [vmem:[%s5898_s6 + $0x40] ss:$16 sps:$4 sm:$0xff]  }
 0x1f4   :  { %3969 = vmatmul.mubr.msk.f32.gmra.mrb[20].mxu1 %vm1171_vm0, %v5158_v39  ;;  %v4114_v39 = vld [vmem:[%s5898_s6 + $0x44] ss:$16 sps:$4 sm:$0xff]  }
 0x1f5   :  { %3971 = vmatprep.mubr.msk.f32.mxu1 %vm1171_vm0, %v5183_v35  ;;  %2335 = vmatprep.subr.bf16.mxu0 %v4114_v39  ;;  %v4127_v35 = vld [vmem:[%s5898_s6 + $0x8] ss:$16 sps:$4 sm:$0xff]  }
 0x1f6   :  { %2336 = vmatpush1.bf16.msra.mxu0 %v4112_v25  ;;  %v4148_v25 = vld [vmem:[%s5898_s6 + $0xc8] ss:$16 sps:$4 sm:$0xff]  }
 0x1f8   :  { %3972 = vmatmul.mubr.msk.f32.gmra.mrb[22].mxu1 %vm1171_vm0, %v5179_v36  ;;  %v4117_v36 = vld [vmem:[%s5898_s6 + $0x64] ss:$16 sps:$4 sm:$0xff]  }
 0x1f9   :  { %3974 = vmatprep.mubr.msk.f32.mxu1 %vm1171_vm0, %v5202_v43  ;;  %v4132_v43 = vld [vmem:[%s5898_s6 + $0x2c] ss:$16 sps:$4 sm:$0xff]   ;;  %2337 = vmatprep.subr.bf16.mxu0 %v4117_v36 }
 0x1fa   :  { %v4150_v36 = vld [vmem:[%s5898_s6 + $0xcc] ss:$16 sps:$4 sm:$0xff]  }
 0x1fc   :  { %3975 = vmatmul.mubr.msk.f32.gmra.mrb[24].mxu1 %vm1171_vm0, %v5197_v53  ;;  %v4129_v53 = vld [vmem:[%s5898_s6 + $0xc] ss:$16 sps:$4 sm:$0xff]  }
 0x1fd   :  { %3977 = vmatprep.mubr.msk.f32.mxu1 %vm1171_vm0, %v5220_v34  ;;  %2372 = vmatprep.subr.bf16.mxu1 %v4129_v53  ;;  %v4130_v34 = vld [vmem:[%s5898_s6 + $0x28] ss:$16 sps:$4 sm:$0xff]  }
 0x1fe   :  { %2373 = vmatpush1.bf16.msra.mxu1 %v4127_v35 }
 0x1ff   :  { %2374 = vmatprep.subr.bf16.mxu1 %v4132_v43  ;;  %v4153_v43 = vld [vmem:[%s5898_s6 + $0xec] ss:$16 sps:$4 sm:$0xff]  }
 0x200   :  { %3978 = vmatmul.mubr.msk.f32.gmra.mrb[26].mxu1 %vm1171_vm0, %v5217_v29  ;;  %v4115_v29 = vld [vmem:[%s5898_s6 + $0x60] ss:$16 sps:$4 sm:$0xff]  }
 0x201   :  { %3980 = vmatprep.mubr.msk.f32.mxu1 %vm1171_vm0, %v5236_v62  ;;  %2338 = vmatpush1.bf16.msra.mxu0 %v4115_v29 }
 0x202   :  { %2375 = vmatpush1.bf16.msra.mxu1 %v4130_v34  ;;  %2339 = vmatprep.subr.bf16.mxu0 %v4120_v56 }
 0x203   :  { %2376 = vmatprep.subr.bf16.mxu1 %v4135_v50 }
 0x204   :  { %3981 = vmatmul.mubr.msk.f32.gmra.mrb[28].mxu1 %vm1171_vm0, %v5233_v26  ;;  %v4126_v26 = vld [vmem:[%s5898_s6 + $0xc4] ss:$16 sps:$4 sm:$0xff]  }
 0x205   :  { %3983 = vmatprep.mubr.msk.f32.mxu1 %vm1171_vm0, %v5255_v54  ;;  %2340 = vmatpush1.bf16.msra.mxu0 %v4118_v24 }
 0x206   :  { %2377 = vmatpush1.bf16.msra.mxu1 %v4133_v37  ;;  %2341 = vmatprep.subr.bf16.mxu0 %v4123_v61 }
 0x207   :  { %2378 = vmatprep.subr.bf16.mxu1 %v4138_v63 }
 0x208   :  { %3984 = vmatmul.mubr.msk.f32.gmra.mrb[30].mxu1 %vm1171_vm0, %v1165_v19 }
 0x209   :  { %2342 = vmatpush1.bf16.msra.mxu0 %v4121_v7 }
 0x20a   :  { %2379 = vmatpush1.bf16.msra.mxu1 %v4136_v33  ;;  %2343 = vmatprep.subr.bf16.mxu0 %v4126_v26  ;;  %v4151_v33 = vld [vmem:[%s5898_s6 + $0xe8] ss:$16 sps:$4 sm:$0xff]   ;;  %s3226_s6 = sld [smem:[#allocation2 + $0x2]] }
 0x20b   :  { %2380 = vmatprep.subr.bf16.mxu1 %v4144_v10 }
 0x20d   :  { %2344 = vmatpush1.bf16.msra.mxu0 %v4124_v23 }
 0x20e   :  { %2345 = vmatprep.subr.bf16.mxu0 %v4141_v4  ;;  %2381 = vmatpush1.bf16.msra.mxu1 %v4142_v46 }
 0x20f   :  { %2382 = vmatprep.subr.bf16.mxu1 %v4147_v45 }
 0x211   :  { %2346 = vmatpush1.bf16.msra.mxu0 %v4139_v21 }
 0x212   :  { %2383 = vmatpush1.bf16.msra.mxu1 %v4145_v1  ;;  %v4165_v1 = vld [vmem:[%s5900_s8 + $0x34] ss:$8 sps:$4 sm:$0xff]  }
 0x213   :  { %2384 = vmatprep.subr.bf16.mxu1 %v4150_v36  ;;  %v4180_v36 = vld [vmem:[%s5900_s8 + $0x84] ss:$8 sps:$4 sm:$0xff]  }
 0x216   :  { %2385 = vmatpush1.bf16.msra.mxu1 %v4148_v25  ;;  %v4175_v25 = vld [vmem:[%s5900_s8 + $0x70] ss:$8 sps:$4 sm:$0xff]  }
 0x217   :  { %2386 = vmatprep.subr.bf16.mxu1 %v4153_v43  ;;  %v4181_v43 = vld [vmem:[%s5900_s8 + $0x90] ss:$8 sps:$4 sm:$0xff]  }
 0x21a   :  { %2387 = vmatpush1.bf16.msra.mxu1 %v4151_v33  ;;  %v4196_v33 = vld [vmem:[%s5900_s8 + $0xe0] ss:$8 sps:$4 sm:$0xff]  }
 0x2bf   :  { %v3964_v62 = vpop.f32.mrb[16].mxu1 }
 0x2c0   :  { %v2022_v28 = vadd.f32 %v3964_v62, %v5511_v12  ;;  %v1919_v47 = vpop.f32.mrb[17].mxu1 }
 0x2c1   :  { %v2021_v32 = vadd.f32 %v5511_v12, %v1919_v47 }
 0x2c2   :  { %vm2038_vm3 = vcmp.ge.f32.partialorder %v2022_v28, 0.0  ;;  %v2055_v17 = vmul.f32 %v5513_v38, %v2022_v28 }
 0x2c3   :  { %vm2037_vm4 = vcmp.ge.f32.partialorder %v2021_v32, 0.0  ;;  %v2054_v18 = vmul.f32 %v5513_v38, %v2021_v32  ;;  %v3967_v30 = vpop.f32.mrb[18].mxu1 }
 0x2c4   :  { %v2071_v2 = vsel %vm2038_vm3, %v2022_v28, %v2055_v17  ;;  %v2024_v3 = vadd.f32 %v3967_v30, %v5511_v12  ;;  %v1929_v5 = vpop.f32.mrb[19].mxu1  ;;  %vm2110_vm3 = vcmask 261120  }
 0x2c5   :  { %v2070_v8 = vsel %vm2037_vm4, %v2021_v32, %v2054_v18  ;;  %v2023_v42 = vadd.f32 %v5511_v12, %v1929_v5  ;;  %vm2112_vm4 = vcmask 523264  }
 0x2c6   :  { %v2086_v41 = vmax.f32 %v2070_v8, %v2071_v2  ;;  %vm2040_vm5 = vcmp.ge.f32.partialorder %v2024_v3, 0.0  ;;  %v2057_v19 = vmul.f32 %v5513_v38, %v2024_v3 }
 0x2c7   :  { %vm2039_vm6 = vcmp.ge.f32.partialorder %v2023_v42, 0.0  ;;  %v2056_v9 = vmul.f32 %v5513_v38, %v2023_v42  ;;  %v3970_v58 = vpop.f32.mrb[20].mxu1 }
 0x2c8   :  { %v5523_v54 = vsel %vm2040_vm5, %v2024_v3, %v2057_v19  ;;  %v2026_v20 = vadd.f32 %v3970_v58, %v5511_v12  ;;  %v1939_v49 = vpop.f32.mrb[21].mxu1  ;;  %vm2114_vm5 = vcmask 785408  }
 0x2c9   :  { %v2072_v14 = vsel %vm2039_vm6, %v2023_v42, %v2056_v9  ;;  %v2025_v31 = vadd.f32 %v5511_v12, %v1939_v49  ;;  %v4314_v42 = vmov 0  }
 0x2ca   :  { %v5536_v55 = vmax.f32 %v2086_v41, %v2072_v14  ;;  %vm2042_vm7 = vcmp.ge.f32.partialorder %v2026_v20, 0.0  ;;  %v2059_v57 = vmul.f32 %v5513_v38, %v2026_v20  ;;  %2363 = vmatprep.mubr.bf16.mxu0 %v4314_v42  ;;  %2404 = vmatprep.mubr.bf16.mxu1 %v4314_v42  ;;  %v4260_v42 = vld [vmem:[%s5902_s10 + $0x68] sm:$0xff]  }
 0x2cb   :  { %vm2041_vm8 = vcmp.ge.f32.partialorder %v2025_v31, 0.0  ;;  %v2058_v40 = vmul.f32 %v5513_v38, %v2025_v31  ;;  %v3973_v48 = vpop.f32.mrb[22].mxu1 }
 0x2cc   :  { %v2075_v60 = vsel %vm2042_vm7, %v2026_v20, %v2059_v57  ;;  %v2028_v44 = vadd.f32 %v3973_v48, %v5511_v12  ;;  %v1949_v15 = vpop.f32.mrb[23].mxu1  ;;  %v2088_v52 = vmax.f32 %v5536_v55, %v5523_v54  ;;  %v4156_v20 = vld [vmem:[%s5900_s8 + $0x4] ss:$8 sps:$4 sm:$0xff]   ;;  %v4157_v54 = vld [vmem:[%s5900_s8 + $0x10] ss:$8 sps:$4 sm:$0xff]  }
 0x2cd   :  { %v2074_v6 = vsel %vm2041_vm8, %v2025_v31, %v2058_v40  ;;  %v2027_v27 = vadd.f32 %v5511_v12, %v1949_v15  ;;  %2826 = vmatprep.subr.bf16.mxu0 %v4156_v20  ;;  %v4162_v55 = vld [vmem:[%s5900_s8 + $0x24] ss:$8 sps:$4 sm:$0xff]  }
 0x2ce   :  { %v2089_v0 = vmax.f32 %v2074_v6, %v2075_v60  ;;  %v2061_v13 = vmul.f32 %v5513_v38, %v2028_v44  ;;  %vm2044_vm10 = vcmp.ge.f32.partialorder %v2028_v44, 0.0 }
 0x2cf   :  { %vm2043_vm9 = vcmp.ge.f32.partialorder %v2027_v27, 0.0  ;;  %v2060_v51 = vmul.f32 %v5513_v38, %v2027_v27  ;;  %v3976_v22 = vpop.f32.mrb[24].mxu1 }
 0x2d0   :  { %v2030_v59 = vadd.f32 %v3976_v22, %v5511_v12  ;;  %v1959_v11 = vpop.f32.mrb[25].mxu1  ;;  %v2077_v56 = vsel %vm2044_vm10, %v2028_v44, %v2061_v13  ;;  %v4168_v13 = vld [vmem:[%s5900_s8 + $0x44] ss:$8 sps:$4 sm:$0xff]   ;;  %v4171_v22 = vld [vmem:[%s5900_s8 + $0x54] ss:$8 sps:$4 sm:$0xff]  }
 0x2d1   :  { %v2029_v16 = vadd.f32 %v5511_v12, %v1959_v11  ;;  %v2076_v39 = vsel %vm2043_vm9, %v2027_v27, %v2060_v51  ;;  %v4159_v27 = vld [vmem:[%s5900_s8 + $0x14] ss:$8 sps:$4 sm:$0xff]   ;;  %v4166_v51 = vld [vmem:[%s5900_s8 + $0x40] ss:$8 sps:$4 sm:$0xff]   ;;  %v4174_v11 = vld [vmem:[%s5900_s8 + $0x64] ss:$8 sps:$4 sm:$0xff]  }
 0x2d2   :  { %vm2046_vm11 = vcmp.ge.f32.partialorder %v2030_v59, 0.0  ;;  %v2063_v35 = vmul.f32 %v5513_v38, %v2030_v59  ;;  %v2090_v53 = vmax.f32 %v2089_v0, %v2076_v39  ;;  %v4163_v0 = vld [vmem:[%s5900_s8 + $0x30] ss:$8 sps:$4 sm:$0xff]   ;;  %v4177_v39 = vld [vmem:[%s5900_s8 + $0x74] ss:$8 sps:$4 sm:$0xff]  }
 0x2d3   :  { %vm2045_vm12 = vcmp.ge.f32.partialorder %v2029_v16, 0.0  ;;  %v2062_v29 = vmul.f32 %v5513_v38, %v2029_v16  ;;  %v3979_v34 = vpop.f32.mrb[26].mxu1 }
 0x2d4   :  { %v2079_v50 = vsel %vm2046_vm11, %v2030_v59, %v2063_v35  ;;  %v2032_v24 = vadd.f32 %v3979_v34, %v5511_v12  ;;  %v1969_v37 = vpop.f32.mrb[27].mxu1  ;;  %v2091_v61 = vmax.f32 %v2090_v53, %v2077_v56  ;;  %v4169_v59 = vld [vmem:[%s5900_s8 + $0x50] ss:$8 sps:$4 sm:$0xff]   ;;  %v4178_v35 = vld [vmem:[%s5900_s8 + $0x80] ss:$8 sps:$4 sm:$0xff]  }
 0x2d5   :  { %v2078_v63 = vsel %vm2045_vm12, %v2029_v16, %v2062_v29  ;;  %v2031_v7 = vadd.f32 %v5511_v12, %v1969_v37  ;;  %v4172_v16 = vld [vmem:[%s5900_s8 + $0x60] ss:$8 sps:$4 sm:$0xff]   ;;  %v4183_v53 = vld [vmem:[%s5900_s8 + $0x94] ss:$8 sps:$4 sm:$0xff]   ;;  %v4186_v29 = vld [vmem:[%s5900_s8 + $0xa4] ss:$8 sps:$4 sm:$0xff]  }
 0x2d6   :  { %v2092_v26 = vmax.f32 %v2078_v63, %v2079_v50  ;;  %2099 = vrot.lane.b32.xlu0 %v2091_v61, %s4313_s22  ;;  %v2065_v23 = vmul.f32 %v5513_v38, %v2032_v24  ;;  %vm2048_vm14 = vcmp.ge.f32.partialorder %v2032_v24, 0.0  ;;  %v4184_v34 = vld [vmem:[%s5900_s8 + $0xa0] ss:$8 sps:$4 sm:$0xff]   ;;  %v4189_v56 = vld [vmem:[%s5900_s8 + $0xb4] ss:$8 sps:$4 sm:$0xff]   ;;  %vm4318_vm12 = vmmov 0  }
 0x2d7   :  { %vm2047_vm13 = vcmp.ge.f32.partialorder %v2031_v7, 0.0  ;;  %v2064_v62 = vmul.f32 %v5513_v38, %v2031_v7  ;;  %v3982_v28 = vpop.f32.mrb[28].mxu1  ;;  %v4187_v50 = vld [vmem:[%s5900_s8 + $0xb0] ss:$8 sps:$4 sm:$0xff]   ;;  %v4190_v37 = vld [vmem:[%s5900_s8 + $0xc0] ss:$8 sps:$4 sm:$0xff]  }
 0x2d8   :  { %v2034_v47 = vadd.f32 %v3982_v28, %v5511_v12  ;;  %v1979_v32 = vpop.f32.mrb[29].mxu1  ;;  %v2081_v8 = vsel %vm2048_vm14, %v2032_v24, %v2065_v23  ;;  %v4192_v24 = vld [vmem:[%s5900_s8 + $0xc4] ss:$8 sps:$4 sm:$0xff]   ;;  %v4195_v61 = vld [vmem:[%s5900_s8 + $0xd4] ss:$8 sps:$4 sm:$0xff]   ;;  %vm3208_vm14 = vcmask 80896  }
 0x2d9   :  { %v2080_v17 = vsel %vm2047_vm13, %v2031_v7, %v2064_v62  ;;  %v2033_v18 = vadd.f32 %v5511_v12, %v1979_v32  ;;  %v4193_v63 = vld [vmem:[%s5900_s8 + $0xd0] ss:$8 sps:$4 sm:$0xff]   ;;  %v4198_v7 = vld [vmem:[%s5900_s8 + $0xe4] ss:$8 sps:$4 sm:$0xff]  }
 0x2da   :  { %vm2050_vm15 = vcmp.ge.f32.partialorder %v2034_v47, 0.0  ;;  %v2067_v30 = vmul.f32 %v5513_v38, %v2034_v47  ;;  %v2093_v2 = vmax.f32 %v2092_v26, %v2080_v17  ;;  %v4201_v26 = vld [vmem:[%s5900_s8 + $0xf4] ss:$8 sps:$4 sm:$0xff]   ;;  %v4199_v23 = vld [vmem:[%s5900_s8 + $0xf0] ss:$8 sps:$4 sm:$0xff]   ;;  %v4250_v28 = vld [vmem:[%s5902_s10 + $0x40] sm:$0xff]  }
 0x2db   :  { %vm2049_vm0 = vcmp.ge.f32.partialorder %v2033_v18, 0.0  ;;  %v2066_v3 = vmul.f32 %v5513_v38, %v2033_v18  ;;  %v3985_v5 = vpop.f32.mrb[30].mxu1  ;;  %v4204_v62 = vld [vmem:[%s5900_s8 + $0x104] ss:$8 sps:$4 sm:$0xff]   ;;  %3693 = vmatprep.subr.bf16.mxu1 %v4250_v28  ;;  %v4231_v28 = vld [vmem:[%s5900_s8 + $0x194] ss:$8 sps:$4 sm:$0xff]  }
 0x2dc   :  { %v2083_v41 = vsel %vm2050_vm15, %v2034_v47, %v2067_v30  ;;  %v2036_v19 = vadd.f32 %v3985_v5, %v5511_v12  ;;  %v1989_v9 = vpop.f32.mrb[31].mxu1  ;;  %v2094_v58 = vmax.f32 %v2093_v2, %v2081_v8  ;;  %v4251_v47 = vld [vmem:[%s5902_s10] sm:$0xff]   ;;  %v4252_v32 = vld [vmem:[%s5902_s10 + $0x48] sm:$0xff]   ;;  %v4255_v30 = vld [vmem:[%s5902_s10 + $0x10] sm:$0xff]  }
 0x2dd   :  { %v2082_v49 = vsel %vm2049_vm0, %v2033_v18, %v2066_v3  ;;  %v2035_v14 = vadd.f32 %v5511_v12, %v1989_v9  ;;  %v4253_v17 = vld [vmem:[%s5902_s10 + $0x8] sm:$0xff]   ;;  %v4254_v18 = vld [vmem:[%s5902_s10 + $0x50] sm:$0xff]   ;;  %v4256_v2 = vld [vmem:[%s5902_s10 + $0x58] sm:$0xff]  }
 0x2de   :  { %2103 = vrot.lane.b32.xlu0 %v2094_v58, %s4315_s5  ;;  %v2095_v31 = vmax.f32 %v2082_v49, %v2083_v41  ;;  %v2069_v21 = vmul.f32 %v5513_v38, %v2036_v19  ;;  %vm2052_vm2 = vcmp.ge.f32.partialorder %v2036_v19, 0.0  ;;  %v4257_v3 = vld [vmem:[%s5902_s10 + $0x18] sm:$0xff]   ;;  %v4258_v5 = vld [vmem:[%s5902_s10 + $0x60] sm:$0xff]   ;;  %v4261_v41 = vld [vmem:[%s5902_s10 + $0x28] sm:$0xff]  }
 0x2df   :  { %vm2051_vm1 = vcmp.ge.f32.partialorder %v2035_v14, 0.0  ;;  %v2068_v4 = vmul.f32 %v5513_v38, %v2035_v14  ;;  %v4154_v38 = vld [vmem:[%s5900_s8] ss:$8 sps:$4 sm:$0xff]  }
 0x2e0   :  { %v2085_v10 = vsel %vm2052_vm2, %v2036_v19, %v2069_v21  ;;  %v4259_v8 = vld [vmem:[%s5902_s10 + $0x20] sm:$0xff]   ;;  %v2151_v19 = vlaneseq }
 0x2e1   :  { %v2084_v46 = vsel %vm2051_vm1, %v2035_v14, %v2068_v4  ;;  %v2149_v49 = vld [vmem:[%s5899_s7] sm:$0xf] }
 0x2e2   :  { %v2096_v57 = vmax.f32 %v2095_v31, %v2084_v46  ;;  %v5721_v9 = vshrl.u32 %v2151_v19, 7  ;;  %v4249_v19 = vld [vmem:[%s5900_s8 + $0x1f4] ss:$8 sps:$4 sm:$0xff]  }
 0x2e4   :  { %v2097_v40 = vmax.f32 %v2096_v57, %v2085_v10  ;;  %v2153_v58 = vsub.s32 0, %v5721_v9  ;;  %v2161_v20 = vsub.s32 2, %v5721_v9  ;;  %v2157_v14 = vsub.s32 1, %v5721_v9 }
 0x2e5   :  { %v2165_v31 = vsub.s32 3, %v5721_v9 }
 0x2e6   :  { %2107 = vrot.lane.b32.xlu1 %v2097_v40, %s4316_s23  ;;  %v2154_v21 = vrot.slane %v2149_v49, %v2153_v58  ;;  %v2162_v4 = vrot.slane %v2149_v49, %v2161_v20  ;;  %v2158_v46 = vrot.slane %v2149_v49, %v2157_v14  ;;  %v2417_v40 = vstv %s3226_s6  ;;  %v4247_v20 = vld [vmem:[%s5900_s8 + $0x1f0] ss:$8 sps:$4 sm:$0xff]   ;;  %s3227_s6 = sld [smem:[#allocation2 + $0x3]] }
 0x2e7   :  { %v2166_v57 = vrot.slane %v2149_v49, %v2165_v31  ;;  %v4262_v31 = vld [vmem:[%s5902_s10 + $0x70] sm:$0xff]  }
 0x348   :  { %v2100_v48 = vpop.permute.xlu0 %2099 }
 0x349   :  { %v2111_v45 = vsel %vm2110_vm3, %v2088_v52, %v2100_v48  ;;  %v4160_v52 = vld [vmem:[%s5900_s8 + $0x20] ss:$8 sps:$4 sm:$0xff]  }
 0x350   :  { %v2104_v12 = vpop.permute.xlu0 %2103 }
 0x351   :  { %v2113_v60 = vsel %vm2112_vm4, %v2111_v45, %v2104_v12 }
 0x358   :  { %v2108_v44 = vpop.permute.xlu1 %2107 }
 0x359   :  { %v2115_v15 = vsel %vm2114_vm5, %v2113_v60, %v2108_v44 }
 0x35a   :  { %v2116_v6 = vpack.c.bf16 %v2115_v15, %v2115_v15 }
 0x35c   :  { %2364 = vmatmul.mubr.bf16.vlgmr.msra.gmra.mrb[64].mxu0 %v2116_v6  ;;  %2405 = vmatmul.mubr.bf16.vlgmr.msra.gmra.mrb[32].mxu1 %v2116_v6 }
 0x35d   :  { %2827 = vmatpush1.bf16.msra.mxu0 %v4154_v38  ;;  %3694 = vmatpush3.bf16.msra.mxu1 %v4251_v47  ;;  %v4229_v47 = vld [vmem:[%s5900_s8 + $0x190] ss:$8 sps:$4 sm:$0xff]  }
 0x35e   :  { %2828 = vmatprep.subr.bf16.mxu0 %v4159_v27  ;;  %3695 = vmatprep.subr.bf16.mxu1 %v4252_v32  ;;  %v4234_v32 = vld [vmem:[%s5900_s8 + $0x1a4] ss:$8 sps:$4 sm:$0xff]  }
 0x361   :  { %2829 = vmatpush1.bf16.msra.mxu0 %v4157_v54  ;;  %3696 = vmatpush3.bf16.msra.mxu1 %v4253_v17  ;;  %v4232_v17 = vld [vmem:[%s5900_s8 + $0x1a0] ss:$8 sps:$4 sm:$0xff]  }
 0x362   :  { %2830 = vmatprep.subr.bf16.mxu0 %v4162_v55  ;;  %3697 = vmatprep.subr.bf16.mxu1 %v4254_v18  ;;  %v4237_v18 = vld [vmem:[%s5900_s8 + $0x1b4] ss:$8 sps:$4 sm:$0xff]  }
 0x365   :  { %2831 = vmatpush1.bf16.msra.mxu0 %v4160_v52  ;;  %3698 = vmatpush3.bf16.msra.mxu1 %v4255_v30  ;;  %v4235_v30 = vld [vmem:[%s5900_s8 + $0x1b0] ss:$8 sps:$4 sm:$0xff]  }
 0x366   :  { %2832 = vmatprep.subr.bf16.mxu0 %v4165_v1  ;;  %3699 = vmatprep.subr.bf16.mxu1 %v4256_v2  ;;  %v4240_v2 = vld [vmem:[%s5900_s8 + $0x1c4] ss:$8 sps:$4 sm:$0xff]  }
 0x369   :  { %2833 = vmatpush1.bf16.msra.mxu0 %v4163_v0  ;;  %3700 = vmatpush3.bf16.msra.mxu1 %v4257_v3  ;;  %v4238_v3 = vld [vmem:[%s5900_s8 + $0x1c0] ss:$8 sps:$4 sm:$0xff]  }
 0x36a   :  { %2834 = vmatprep.subr.bf16.mxu0 %v4168_v13  ;;  %3701 = vmatprep.subr.bf16.mxu1 %v4258_v5  ;;  %v4243_v5 = vld [vmem:[%s5900_s8 + $0x1d4] ss:$8 sps:$4 sm:$0xff]  }
 0x36d   :  { %2835 = vmatpush1.bf16.msra.mxu0 %v4166_v51  ;;  %3702 = vmatpush3.bf16.msra.mxu1 %v4259_v8  ;;  %v4241_v8 = vld [vmem:[%s5900_s8 + $0x1d0] ss:$8 sps:$4 sm:$0xff]  }
 0x36e   :  { %2836 = vmatprep.subr.bf16.mxu0 %v4171_v22  ;;  %3703 = vmatprep.subr.bf16.mxu1 %v4260_v42  ;;  %v4246_v42 = vld [vmem:[%s5900_s8 + $0x1e4] ss:$8 sps:$4 sm:$0xff]  }
 0x371   :  { %2837 = vmatpush1.bf16.msra.mxu0 %v4169_v59  ;;  %3704 = vmatpush3.bf16.msra.mxu1 %v4261_v41  ;;  %v4244_v41 = vld [vmem:[%s5900_s8 + $0x1e0] ss:$8 sps:$4 sm:$0xff]  }
 0x372   :  { %2838 = vmatprep.subr.bf16.mxu0 %v4174_v11  ;;  %3705 = vmatprep.subr.bf16.mxu1 %v4262_v31 }
 0x375   :  { %2839 = vmatpush1.bf16.msra.mxu0 %v4172_v16 }
 0x376   :  { %2840 = vmatprep.subr.bf16.mxu0 %v4177_v39  ;;  %v4202_v39 = vld [vmem:[%s5900_s8 + $0x100] ss:$8 sps:$4 sm:$0xff]  }
 0x379   :  { %2841 = vmatpush1.bf16.msra.mxu0 %v4175_v25 }
 0x37a   :  { %2842 = vmatprep.subr.bf16.mxu0 %v4180_v36  ;;  %v4207_v36 = vld [vmem:[%s5900_s8 + $0x114] ss:$8 sps:$4 sm:$0xff]  }
 0x37d   :  { %2843 = vmatpush1.bf16.msra.mxu0 %v4178_v35 }
 0x37e   :  { %2844 = vmatprep.subr.bf16.mxu0 %v4183_v53  ;;  %v4205_v53 = vld [vmem:[%s5900_s8 + $0x110] ss:$8 sps:$4 sm:$0xff]  }
 0x381   :  { %2845 = vmatpush1.bf16.msra.mxu0 %v4181_v43  ;;  %v4210_v43 = vld [vmem:[%s5900_s8 + $0x124] ss:$8 sps:$4 sm:$0xff]  }
 0x382   :  { %2846 = vmatprep.subr.bf16.mxu0 %v4186_v29  ;;  %v4208_v29 = vld [vmem:[%s5900_s8 + $0x120] ss:$8 sps:$4 sm:$0xff]  }
 0x385   :  { %2847 = vmatpush1.bf16.msra.mxu0 %v4184_v34  ;;  %v4213_v34 = vld [vmem:[%s5900_s8 + $0x134] ss:$8 sps:$4 sm:$0xff]  }
 0x386   :  { %2848 = vmatprep.subr.bf16.mxu0 %v4189_v56  ;;  %v4211_v56 = vld [vmem:[%s5900_s8 + $0x130] ss:$8 sps:$4 sm:$0xff]  }
 0x389   :  { %2849 = vmatpush1.bf16.msra.mxu0 %v4187_v50  ;;  %v4216_v50 = vld [vmem:[%s5900_s8 + $0x144] ss:$8 sps:$4 sm:$0xff]  }
 0x38a   :  { %2850 = vmatprep.subr.bf16.mxu0 %v4192_v24  ;;  %v4214_v24 = vld [vmem:[%s5900_s8 + $0x140] ss:$8 sps:$4 sm:$0xff]  }
 0x38d   :  { %2851 = vmatpush1.bf16.msra.mxu0 %v4190_v37  ;;  %v4219_v37 = vld [vmem:[%s5900_s8 + $0x154] ss:$8 sps:$4 sm:$0xff]  }
 0x38e   :  { %2852 = vmatprep.subr.bf16.mxu0 %v4195_v61  ;;  %v4217_v61 = vld [vmem:[%s5900_s8 + $0x150] ss:$8 sps:$4 sm:$0xff]  }
 0x391   :  { %2853 = vmatpush1.bf16.msra.mxu0 %v4193_v63  ;;  %v4222_v63 = vld [vmem:[%s5900_s8 + $0x164] ss:$8 sps:$4 sm:$0xff]  }
 0x392   :  { %2854 = vmatprep.subr.bf16.mxu0 %v4198_v7  ;;  %v4220_v7 = vld [vmem:[%s5900_s8 + $0x160] ss:$8 sps:$4 sm:$0xff]  }
 0x395   :  { %2855 = vmatpush1.bf16.msra.mxu0 %v4196_v33  ;;  %v4225_v33 = vld [vmem:[%s5900_s8 + $0x174] ss:$8 sps:$4 sm:$0xff]  }
 0x396   :  { %2856 = vmatprep.subr.bf16.mxu0 %v4201_v26  ;;  %v4223_v26 = vld [vmem:[%s5900_s8 + $0x170] ss:$8 sps:$4 sm:$0xff]  }
 0x399   :  { %2857 = vmatpush1.bf16.msra.mxu0 %v4199_v23  ;;  %v4228_v23 = vld [vmem:[%s5900_s8 + $0x184] ss:$8 sps:$4 sm:$0xff]  }
 0x39a   :  { %2867 = vmatprep.subr.bf16.mxu0 %v4204_v62  ;;  %v4226_v62 = vld [vmem:[%s5900_s8 + $0x180] ss:$8 sps:$4 sm:$0xff]  }
 0x42f   :  { %v2365_v10 = vpop.f32.mrb[64].mxu0  ;;  %v2406_v48 = vpop.f32.mrb[32].mxu1 }
 0x430   :  { %v2366_v12 = vadd.f32 %v2365_v10, %v2154_v21  ;;  %v2407_v45 = vadd.f32 %v2406_v48, %v2162_v4  ;;  %v2367_v60 = vpop.f32.mrb[65].mxu0  ;;  %v2408_v44 = vpop.f32.mrb[33].mxu1  ;;  %v4263_v21 = vld [vmem:[%s5902_s10 + $0x30] sm:$0xff]   ;;  %v4264_v4 = vld [vmem:[%s5902_s10 + $0x78] sm:$0xff]   ;;  %v2494_v10 = vld [vmem:[%s5901_s9] sm:$0x3] }
 0x431   :  { %v2368_v15 = vadd.f32 %v2367_v60, %v2158_v46  ;;  %v2409_v38 = vadd.f32 %v2408_v44, %v2166_v57  ;;  %v2369_v6 = vpop.f32.mrb[66].mxu0  ;;  %v2410_v27 = vpop.f32.mrb[34].mxu1  ;;  %3706 = vmatpush3.bf16.msra.mxu1 %v4263_v21  ;;  %v4265_v46 = vld [vmem:[%s5902_s10 + $0x38] sm:$0xff]   ;;  %v4317_v57 = vmov 0.0   ;;  %v2503_v48 = vrot.slane %v2494_v10, %v2157_v14  ;;  %v4267_v14 = vld [vmem:[%s5904_s12 + $0x8] sm:$0xff]  }
 0x432   :  { %vm2413_vm6 = vcmp.ge.f32.partialorder %v2366_v12, 0.0  ;;  %v2418_v54 = vmul.f32 %v2417_v40, %v2366_v12  ;;  %vm2415_vm7 = vcmp.ge.f32.partialorder %v2407_v45, 0.0  ;;  %v2420_v55 = vmul.f32 %v2417_v40, %v2407_v45  ;;  %v2370_v52 = vpop.f32.mrb[67].mxu0  ;;  %v2411_v1 = vpop.f32.mrb[35].mxu1  ;;  %3707 = vmatprep.subr.bf16.mxu1 %v4264_v4 }
 0x433   :  { %vm2414_vm8 = vcmp.ge.f32.partialorder %v2368_v15, 0.0  ;;  %v2419_v0 = vmul.f32 %v2417_v40, %v2368_v15  ;;  %vm2416_vm9 = vcmp.ge.f32.partialorder %v2409_v38, 0.0  ;;  %v2421_v13 = vmul.f32 %v2417_v40, %v2409_v38 }
 0x434   :  { %v2422_v51 = vsel %vm2413_vm6, %v2366_v12, %v2418_v54  ;;  %v5734_v22 = vsel %vm2415_vm7, %v2407_v45, %v2420_v55  ;;  %v2499_v40 = vrot.slane %v2494_v10, %v2153_v58  ;;  %v2910_v45 = vstv %s3227_s6  ;;  %v4266_v58 = vld [vmem:[%s5904_s12] sm:$0xff]  }
 0x435   :  { %v2423_v59 = vsel %vm2414_vm8, %v2368_v15, %v2419_v0  ;;  %v2425_v11 = vsel %vm2416_vm9, %v2409_v38, %v2421_v13  ;;  %v2426_v25 = vpack.c.bf16 %v2422_v51, %v2422_v51  ;;  %v2428_v49 = vpack.c.bf16 %v5734_v22, %v5734_v22  ;;  %3708 = vmatpush3.bf16.msra.mxu1 %v4265_v46  ;;  %v4268_v0 = vld [vmem:[%s5904_s12 + $0x10] sm:$0xff]   ;;  %v4269_v13 = vld [vmem:[%s5904_s12 + $0x18] sm:$0xff]   ;;  %v4270_v51 = vld [vmem:[%s5904_s12 + $0x20] sm:$0xff]  }
 0x436   :  { %v2427_v16 = vpack.c.bf16 %v2423_v59, %v2423_v59  ;;  %v2429_v35 = vpack.c.bf16 %v2425_v11, %v2425_v11  ;;  %3986 = vmatprep.subr.bf16.mxu1 %v4317_v57  ;;  %v4271_v22 = vld [vmem:[%s5904_s12 + $0x28] sm:$0xff]   ;;  %v4272_v59 = vld [vmem:[%s5904_s12 + $0x30] sm:$0xff]   ;;  %v4273_v11 = vld [vmem:[%s5904_s12 + $0x38] sm:$0xff]  }
 0x438   :  { %2858 = vmatprep.mubr.bf16.mxu0 %v2427_v16 }
 0x439   :  { %2859 = vmatmul.mubr.bf16.vlgmr.msra.gmra.mrb[68].mxu0 %v2426_v25 }
 0x43a   :  { %2868 = vmatpush1.bf16.msra.mxu0 %v4202_v39  ;;  %2899 = vmatprep.mubr.bf16.mxu0 %v2429_v35  ;;  %v3496_v39 = vld [vmem:[%s5903_s11] ss:$0 sm:$0xff]  ;;  %s4286_s11 = scalar_lea.vmem %s3217_s21, 128 }
 0x43b   :  { %2869 = vmatprep.subr.bf16.mxu0 %v4207_v36  ;;  %p4287_p5 = scmp.ne.s32.totalorder %s3217_s21, %s4286_s11  ;;  %p4292_p7 = scmp.lt.s32.totalorder %s4286_s11, %s4286_s11 }
 0x43d   :  { %p4293_p8 = por %p4292_p7, %p4291_p6 }
 0x43e   :  { %2870 = vmatpush1.bf16.msra.mxu0 %v4205_v53  ;;  %v3093_v53 = vstv %s3228_s18 }
 0x43f   :  { %2871 = vmatprep.subr.bf16.mxu0 %v4210_v43  ;;  %p4294_p9 = pnand %p4293_p8, %p4287_p5 }
 0x442   :  { %2872 = vmatpush1.bf16.msra.mxu0 %v4208_v29 }
 0x443   :  { %2873 = vmatprep.subr.bf16.mxu0 %v4213_v34 }
 0x446   :  { %2874 = vmatpush1.bf16.msra.mxu0 %v4211_v56 }
 0x447   :  { %2875 = vmatprep.subr.bf16.mxu0 %v4216_v50 }
 0x44a   :  { %2876 = vmatpush1.bf16.msra.mxu0 %v4214_v24  ;;  %v3513_v24 = vld [vmem:[%s5905_s13] ss:$0 sm:$0xff] }
 0x44b   :  { %2877 = vmatprep.subr.bf16.mxu0 %v4219_v37 }
 0x44e   :  { %2878 = vmatpush1.bf16.msra.mxu0 %v4217_v61 }
 0x44f   :  { %2879 = vmatprep.subr.bf16.mxu0 %v4222_v63 }
 0x452   :  { %2880 = vmatpush1.bf16.msra.mxu0 %v4220_v7 }
 0x453   :  { %2881 = vmatprep.subr.bf16.mxu0 %v4225_v33 }
 0x456   :  { %2882 = vmatpush1.bf16.msra.mxu0 %v4223_v26 }
 0x457   :  { %2883 = vmatprep.subr.bf16.mxu0 %v4228_v23 }
 0x45a   :  { %2884 = vmatpush1.bf16.msra.mxu0 %v4226_v62 }
 0x45b   :  { %2885 = vmatprep.subr.bf16.mxu0 %v4231_v28 }
 0x45e   :  { %2886 = vmatpush1.bf16.msra.mxu0 %v4229_v47 }
 0x45f   :  { %2887 = vmatprep.subr.bf16.mxu0 %v4234_v32 }
 0x462   :  { %2888 = vmatpush1.bf16.msra.mxu0 %v4232_v17 }
 0x463   :  { %2889 = vmatprep.subr.bf16.mxu0 %v4237_v18 }
 0x466   :  { %2890 = vmatpush1.bf16.msra.mxu0 %v4235_v30 }
 0x467   :  { %2891 = vmatprep.subr.bf16.mxu0 %v4240_v2 }
 0x46a   :  { %2892 = vmatpush1.bf16.msra.mxu0 %v4238_v3 }
 0x46b   :  { %2893 = vmatprep.subr.bf16.mxu0 %v4243_v5 }
 0x46e   :  { %2894 = vmatpush1.bf16.msra.mxu0 %v4241_v8 }
 0x46f   :  { %2895 = vmatprep.subr.bf16.mxu0 %v4246_v42 }
 0x472   :  { %2896 = vmatpush1.bf16.msra.mxu0 %v4244_v41 }
 0x473   :  { %2897 = vmatprep.subr.bf16.mxu0 %v4249_v19 }
 0x476   :  { %2898 = vmatpush1.bf16.msra.mxu0 %v4247_v20 }
 0x479   :  { %2900 = vmatmul.mubr.bf16.vlgmr.msra.gmra.mrb[68].mxu0 %v2428_v49 }
 0x54c   :  { %v2901_v12 = vpop.f32.mrb[68].mxu0 }
 0x54d   :  { %v4028_v60 = vadd.f32 %v2901_v12, %v2499_v40  ;;  %v2903_v44 = vpop.f32.mrb[69].mxu0 }
 0x54e   :  { %v4029_v15 = vadd.f32 %v2903_v44, %v2503_v48  ;;  %v2905_v38 = vpop.f32.mrb[70].mxu0 }
 0x54f   :  { %vm2908_vm10 = vcmp.ge.f32.partialorder %v4028_v60, 0.0  ;;  %v2911_v6 = vmul.f32 %v4028_v60, %v2910_v45  ;;  %v2906_v27 = vpop.f32.mrb[71].mxu0 }
 0x550   :  { %vm2909_vm11 = vcmp.ge.f32.partialorder %v4029_v15, 0.0  ;;  %v2912_v54 = vmul.f32 %v4029_v15, %v2910_v45 }
 0x551   :  { %v2913_v55 = vsel %vm2908_vm10, %v4028_v60, %v2911_v6 }
 0x552   :  { %v2914_v52 = vsel %vm2909_vm11, %v4029_v15, %v2912_v54  ;;  %v2915_v9 = vpack.c.bf16 %v2913_v55, %v2913_v55 }
 0x553   :  { %v2916_v1 = vpack.c.bf16 %v2914_v52, %v2914_v52 }
 0x555   :  { %3084 = vmatprep.mubr.bf16.mxu1 %v2916_v1 }
 0x556   :  { %3085 = vmatmul.mubr.bf16.vlgmr.msra.gmra.mrb[36].mxu1 %v2915_v9 }
 0x557   :  { %3987 = vmatpush3.bf16.msra.mxu1 %v4266_v58  ;;  %4002 = vmatprep.mubr.msk.bf16.mxu1 %vm4318_vm12, %v4317_v57 }
 0x558   :  { %3988 = vmatprep.subr.bf16.mxu1 %v4317_v57 }
 0x55b   :  { %3989 = vmatpush3.bf16.msra.mxu1 %v4267_v14 }
 0x55c   :  { %3990 = vmatprep.subr.bf16.mxu1 %v4317_v57 }
 0x55f   :  { %3991 = vmatpush3.bf16.msra.mxu1 %v4268_v0 }
 0x560   :  { %3992 = vmatprep.subr.bf16.mxu1 %v4317_v57 }
 0x563   :  { %3993 = vmatpush3.bf16.msra.mxu1 %v4269_v13 }
 0x564   :  { %3994 = vmatprep.subr.bf16.mxu1 %v4317_v57 }
 0x567   :  { %3995 = vmatpush3.bf16.msra.mxu1 %v4270_v51 }
 0x568   :  { %3996 = vmatprep.subr.bf16.mxu1 %v4317_v57 }
 0x56b   :  { %3997 = vmatpush3.bf16.msra.mxu1 %v4271_v22 }
 0x56c   :  { %3998 = vmatprep.subr.bf16.mxu1 %v4317_v57 }
 0x56f   :  { %3999 = vmatpush3.bf16.msra.mxu1 %v4272_v59 }
 0x570   :  { %4000 = vmatprep.subr.bf16.mxu1 %v4317_v57 }
 0x573   :  { %4001 = vmatpush3.bf16.msra.mxu1 %v4273_v11 }
 0x629   :  { %v3709_v16 = vpop.f32.mrb[36].mxu1 }
 0x62a   :  { %v3710_v25 = vpop.f32.mrb[37].mxu1 }
 0x62b   :  { %v3711_v36 = vadd.f32 %v3710_v25, %v3709_v16  ;;  %v3712_v35 = vpop.f32.mrb[38].mxu1 }
 0x62c   :  { %v3713_v43 = vpop.f32.mrb[39].mxu1 }
 0x62d   :  { %v3087_v29 = vadd.f32 %v3711_v36, %v3496_v39 }
 0x62f   :  { %vm3092_vm13 = vcmp.ge.f32.partialorder %v3087_v29, 0.0  ;;  %v3094_v34 = vmul.f32 %v3093_v53, %v3087_v29 }
 0x631   :  { %v3095_v56 = vsel %vm3092_vm13, %v3087_v29, %v3094_v34 }
 0x632   :  { %v3096_v50 = vpack.c.bf16 %v3095_v56, %v3095_v56 }
 0x634   :  { %4003 = vmatmul.mubr.bf16.vlgmr.msra.gmra.mrb[40].mxu1 %v3096_v50 }
 0x707   :  { %v3202_v37 = vpop.f32.mrb[40].mxu1 }
 0x708   :  { %v3203_v61 = vadd.f32 %v3513_v24, %v3202_v37  ;;  %v4004_v63 = vpop.f32.mrb[41].mxu1 }
 0x709   :  { %v3205_v7 = vpop.f32.mrb[42].mxu1 }
 0x70a   :  { %v4005_v33 = vpop.f32.mrb[43].mxu1  ;;  %3209 = vst.msk [vmem:[#allocation5] sm:$0xff] %vm3208_vm14, %v3203_v61 }
 0x70b   :  { %4297 = shalt.err (!%p4294_p9)
}
 0x70c   :  { %s4298_s13 = scalar_lea.hbm %s5906_s14, 128 }
 0x70d   :  { %p4299_p10 = scmp.ne.s32.totalorder %s5906_s14, %s4298_s13  ;;  %p4302_p11 = scmp.lt.u32.totalorder %s4298_s13, %s5906_s14 }
 0x70f   :  { %p4304_p12 = pnand %p4302_p11, %p4299_p10 }
 0x711   :  { %4307 = shalt.err (!%p4304_p12)
}
 0x712   :  { %3219 = dma.vmem_to_hbm [thread:$0]  %s3217_s21, 128, %s5906_s14, [#allocation3]  }
 0x713   :  { %4310 = dma.done.wait [#allocation3], 128  }
 0x714   :  { %4311 = vsyncadd [#allocation3], 4294967168 }
 0x715   :  { %3223 = vsyncpa [#allocation3], 1 }
 0x716   :  { %3224 = vsyncpa [#allocation4], 1 }

</bundles_post_ra>
